<compile_context>
chip_gen: v6e
topology: v6e:2x2x1
jax: 0.10.0
libtpu: 0.0.40
codegen_flags: <defaults>
</compile_context>

<pallas_src>
import functools

import jax
import jax.numpy as jnp
from jax.experimental import pallas as pl
from jax.experimental.pallas import tpu as pltpu


# ----------------------------------------------------------------------------
# Fused Pallas kernel (one batch image per grid step)
# ----------------------------------------------------------------------------
def _shuffle_up_kernel(x_ref, ps_ref, br_ref, s_ref, mask_ref,
                       wup_ref, bup_ref, w1_ref, b1_ref, w2_ref, b2_ref,
                       wi_ref, bi_ref, o_ref, p_ref, cat_ref,
                       *, H, W, Cin, Cps, Cb, Cmid, slope):
    HW = H * W
    Ccat = Cps + Cmid + Cb
    masks = mask_ref[...]                                    # (9, HW) f32, 0/1

    def im2col_bf16(a, C):
        """Write P[t*C + c, p] = a[c, p + d_t] (0 for out-of-image taps) into
        the scratch patch buffer and return it as bf16 for one big matmul."""
        p_ref[0:9 * C, :] = jnp.zeros((9 * C, HW), jnp.float32)
        for kh in range(3):
            for kw in range(3):
                t = kh * 3 + kw
                d = (kh - 1) * W + (kw - 1)                  # flat spatial shift
                lo = max(0, -d)                              # first valid output lane
                length = HW - abs(d)
                v = (a[:, lo + d:lo + d + length]
                     * masks[t:t + 1, lo:lo + length])       # zero the W-bleed/border
                p_ref[t * C:(t + 1) * C, lo:lo + length] = v
        return p_ref[0:9 * C, :].astype(jnp.bfloat16)

    # --- up_p = Conv3x3(nearest_upsample_2x(x)) ------------------------------
    # nearest upsample as a 0/1 selection matmul: (Cin, HinWin) @ (HinWin, HW)
    x_up = jnp.dot(x_ref[...], s_ref[...],
                   preferred_element_type=jnp.float32)       # (Cin, HW) f32
    pu = im2col_bf16(x_up, Cin)                              # (9*Cin, HW) bf16
    up_p = jnp.dot(wup_ref[...], pu,
                   preferred_element_type=jnp.float32) + bup_ref[...]   # (Cmid, HW)

    # --- cat = [PixelShuffle(x), up_p, bridge]  (kept entirely in VMEM) ------
    cat_ref[0:Cps, :] = ps_ref[...].astype(jnp.float32)
    cat_ref[Cps:Cps + Cmid, :] = up_p
    cat_ref[Cps + Cmid:Ccat, :] = br_ref[...].astype(jnp.float32)
    cat = cat_ref[...]                                       # (Ccat, HW) f32

    # --- h = LeakyReLU(Conv3x3(cat))          (conv_1 + relu_1) --------------
    p1 = im2col_bf16(cat, Ccat)                              # (9*Ccat, HW)
    h = jnp.dot(w1_ref[...], p1,
                preferred_element_type=jnp.float32) + b1_ref[...]
    h = jnp.where(h >= 0, h, h * slope)

    # --- out = LeakyReLU(Conv3x3(h)) + Conv1x1(cat)  (conv_2 + identity) -----
    p2 = im2col_bf16(h, Cmid)                                # (9*Cmid, HW)
    out = jnp.dot(w2_ref[...], p2,
                  preferred_element_type=jnp.float32) + b2_ref[...]
    out = jnp.where(out >= 0, out, out * slope)
    ident = jnp.dot(wi_ref[...], cat.astype(jnp.bfloat16),
                    preferred_element_type=jnp.float32) + bi_ref[...]
    o_ref[...] = (out + ident).astype(o_ref.dtype)           # (Cmid, HW) lane-dense


# ----------------------------------------------------------------------------
# Small host-side constant builders (constant-folded by XLA)
# ----------------------------------------------------------------------------
def _upsample_select_matrix(Hin, Win):
    """S[q, p] = 1  iff  low-res flat index q is the nearest-neighbour source of
    high-res flat index p (2x upsample)."""
    Wout = 2 * Win
    p = jnp.arange(4 * Hin * Win)
    src = (p // Wout // 2) * Win + (p % Wout) // 2
    q = jnp.arange(Hin * Win)
    return (q[:, None] == src[None, :]).astype(jnp.bfloat16)


def _border_masks(H, W):
    """masks[t, p] = 1 iff tap t of a SAME 3x3 conv at output p stays in-image."""
    p = jnp.arange(H * W)
    h = p // W
    w = p % W
    rows = []
    for kh in range(3):
        for kw in range(3):
            dh, dw = kh - 1, kw - 1
            ok = (h + dh >= 0) & (h + dh < H) & (w + dw >= 0) & (w + dw < W)
            rows.append(ok)
    return jnp.stack(rows, axis=0).astype(jnp.float32)


def pixel_shuffle2_nchw(x):
    """PixelShuffle(2) with PyTorch channel ordering, NCHW layout."""
    N, C4, H, W = x.shape
    C = C4 // 4
    y = x.reshape(N, C, 2, 2, H, W)
    y = y.transpose(0, 1, 4, 2, 5, 3)           # (N, C, H, 2, W, 2)
    return y.reshape(N, C, 2 * H, 2 * W)


# ----------------------------------------------------------------------------
# Wrapper: pallas_call plumbing
# ----------------------------------------------------------------------------
def shuffle_up_block_forward(x, bridge, params, relu_slope):
    """x: (N, in_size, Hin, Win) NCHW; bridge: (N, out_size, 2Hin, 2Win)."""
    N, Cin, Hin, Win = x.shape
    H, W = 2 * Hin, 2 * Win
    HW = H * W
    Cmid = params["w_up"].shape[-1]             # out_size
    Cps = Cin // 4
    Cb = bridge.shape[1]
    Ccat = Cps + Cmid + Cb
    Cmax = max(Cin, Ccat, Cmid)
    bf16 = jnp.bfloat16

    # glue (cheap, smallest tensors): pixel shuffle + flatten + bf16 cast
    ps_flat = pixel_shuffle2_nchw(x).reshape(N, Cps, HW).astype(bf16)
    x_flat = x.reshape(N, Cin, Hin * Win).astype(bf16)
    br_flat = bridge.reshape(N, Cb, HW).astype(bf16)
    sel = _upsample_select_matrix(Hin, Win)                   # (HinWin, HW) bf16
    masks = _border_masks(H, W)                               # (9, HW) f32

    # conv weights in im2col layout (Cout, 9*Cin), tap-major / channel-minor
    wup = params["w_up"].reshape(9 * Cin, Cmid).T.astype(bf16)
    w1m = params["w1"].reshape(9 * Ccat, Cmid).T.astype(bf16)
    w2m = params["w2"].reshape(9 * Cmid, Cmid).T.astype(bf16)
    wim = params["wi"].T.astype(bf16)                         # (Cmid, Ccat)
    bup = params["b_up"].reshape(Cmid, 1)
    b1 = params["b1"].reshape(Cmid, 1)
    b2 = params["b2"].reshape(Cmid, 1)
    bi = params["bi"].reshape(Cmid, 1)

    kernel = functools.partial(_shuffle_up_kernel, H=H, W=W, Cin=Cin, Cps=Cps,
                               Cb=Cb, Cmid=Cmid, slope=float(relu_slope))

    flops = int(2 * N * HW * (Cin * Hin * Win            # upsample selection matmul
                              + 9 * Cin * Cmid           # up_p conv
                              + 9 * Ccat * Cmid          # conv_1
                              + 9 * Cmid * Cmid          # conv_2
                              + Ccat * Cmid))            # 1x1 identity
    bytes_accessed = int(
        2 * (x_flat.size + ps_flat.size + br_flat.size + sel.size
             + wup.size + w1m.size + w2m.size + wim.size)
        + 4 * (masks.size + 4 * Cmid)
        + 4 * N * Cmid * HW)

    out_flat = pl.pallas_call(
        kernel,
        out_shape=jax.ShapeDtypeStruct((N, Cmid, HW), jnp.float32),
        grid_spec=pltpu.PrefetchScalarGridSpec(
            num_scalar_prefetch=0,
            grid=(N,),
            in_specs=[
                pl.BlockSpec((None, Cin, Hin * Win), lambda n: (n, 0, 0)),  # x
                pl.BlockSpec((None, Cps, HW), lambda n: (n, 0, 0)),         # pixel-shuffled x
                pl.BlockSpec((None, Cb, HW), lambda n: (n, 0, 0)),          # bridge
                pl.BlockSpec((Hin * Win, HW), lambda n: (0, 0)),            # upsample select
                pl.BlockSpec((9, HW), lambda n: (0, 0)),                    # border masks
                pl.BlockSpec((Cmid, 9 * Cin), lambda n: (0, 0)),            # w_up
                pl.BlockSpec((Cmid, 1), lambda n: (0, 0)),                  # b_up
                pl.BlockSpec((Cmid, 9 * Ccat), lambda n: (0, 0)),           # w1
                pl.BlockSpec((Cmid, 1), lambda n: (0, 0)),                  # b1
                pl.BlockSpec((Cmid, 9 * Cmid), lambda n: (0, 0)),           # w2
                pl.BlockSpec((Cmid, 1), lambda n: (0, 0)),                  # b2
                pl.BlockSpec((Cmid, Ccat), lambda n: (0, 0)),               # wi (1x1)
                pl.BlockSpec((Cmid, 1), lambda n: (0, 0)),                  # bi
            ],
            out_specs=pl.BlockSpec((None, Cmid, HW), lambda n: (n, 0, 0)),
            scratch_shapes=[
                pltpu.VMEM((9 * Cmax, HW), jnp.float32),   # im2col patch buffer
                pltpu.VMEM((Ccat, HW), jnp.float32),       # cat (never hits HBM)
            ],
        ),
        compiler_params=pltpu.CompilerParams(
            dimension_semantics=("parallel",)),
        cost_estimate=pl.CostEstimate(flops=flops, transcendentals=0,
                                      bytes_accessed=bytes_accessed),
    )(x_flat, ps_flat, br_flat, sel, masks,
      wup, bup, w1m, b1, w2m, b2, wim, bi)

    return out_flat.reshape(N, Cmid, H, W)


# ----------------------------------------------------------------------------
# Deterministic parameter init (synthetic; shapes follow the module __init__)
# ----------------------------------------------------------------------------
def init_params(key, in_size, out_size, bridge=True):
    cat_c = in_size // 4 + out_size + (out_size if bridge else 0)
    ks = jax.random.split(key, 8)
    s = 0.1
    f32 = jnp.float32
    return dict(
        w_up=s * jax.random.normal(ks[0], (3, 3, in_size, out_size), f32),
        b_up=s * jax.random.normal(ks[1], (out_size,), f32),
        w1=s * jax.random.normal(ks[2], (3, 3, cat_c, out_size), f32),
        b1=s * jax.random.normal(ks[3], (out_size,), f32),
        w2=s * jax.random.normal(ks[4], (3, 3, out_size, out_size), f32),
        b2=s * jax.random.normal(ks[5], (out_size,), f32),
        wi=s * jax.random.normal(ks[6], (cat_c, out_size), f32),
        bi=s * jax.random.normal(ks[7], (out_size,), f32),
    )


# ----------------------------------------------------------------------------
# Pure-JAX (f32) reference for the sanity check
# ----------------------------------------------------------------------------
def _conv_ref(x, w, b, slope=None):
    out = jax.lax.conv_general_dilated(
        x, w, (1, 1), "SAME",
        dimension_numbers=("NCHW", "HWIO", "NCHW")) + b[None, :, None, None]
    if slope is not None:
        out = jnp.where(out >= 0, out, out * slope)
    return out


def reference_forward(x, bridge, params, relu_slope):
    ps = pixel_shuffle2_nchw(x)
    x_up = jnp.repeat(jnp.repeat(x, 2, axis=2), 2, axis=3)
    up_p = _conv_ref(x_up, params["w_up"], params["b_up"])
    cat = jnp.concatenate([ps, up_p, bridge], axis=1)
    h = _conv_ref(cat, params["w1"], params["b1"], relu_slope)
    out2 = _conv_ref(h, params["w2"], params["b2"], relu_slope)
    ident = (jnp.einsum("nchw,co->nohw", cat, params["wi"])
             + params["bi"][None, :, None, None])
    return out2 + ident


# ----------------------------------------------------------------------------
if __name__ == "__main__":
    N, in_size, out_size = 2, 16, 4        # in_size = 4 * out_size (PixelShuffle)
    Hin = Win = 8
    relu_slope = 0.2

    key = jax.random.PRNGKey(0)
    k1, k2, k3 = jax.random.split(key, 3)
    x = jax.random.normal(k1, (N, in_size, Hin, Win), jnp.float32)          # NCHW
    bridge = jax.random.normal(k2, (N, out_size, 2 * Hin, 2 * Win), jnp.float32)
    params = init_params(k3, in_size, out_size, bridge=True)

    out = shuffle_up_block_forward(x, bridge, params, relu_slope)
    out = jax.block_until_ready(out)
    assert out.shape == (N, out_size, 2 * Hin, 2 * Win)

    ref = reference_forward(x, bridge, params, relu_slope)
    err = float(jnp.max(jnp.abs(out - ref)))
    # bf16 matmul inputs with f32 accumulation -> a few 1e-3 absolute error.
    assert err < 5e-2, f"mismatch vs reference: {err}"

    print("KERNEL_OK")
</pallas_src>

<mosaic_0001>
module attributes {stable_mosaic.version = 11 : i64} {
  func.func @_shuffle_up_kernel(%arg0: i32, %arg1: memref<1x16x64xbf16, #tpu.memory_space<vmem>>, %arg2: memref<1x4x256xbf16, #tpu.memory_space<vmem>>, %arg3: memref<1x4x256xbf16, #tpu.memory_space<vmem>>, %arg4: memref<64x256xbf16, #tpu.memory_space<vmem>>, %arg5: memref<9x256xf32, #tpu.memory_space<vmem>>, %arg6: memref<4x144xbf16, #tpu.memory_space<vmem>>, %arg7: memref<4x1xf32, #tpu.memory_space<vmem>>, %arg8: memref<4x108xbf16, #tpu.memory_space<vmem>>, %arg9: memref<4x1xf32, #tpu.memory_space<vmem>>, %arg10: memref<4x36xbf16, #tpu.memory_space<vmem>>, %arg11: memref<4x1xf32, #tpu.memory_space<vmem>>, %arg12: memref<4x12xbf16, #tpu.memory_space<vmem>>, %arg13: memref<4x1xf32, #tpu.memory_space<vmem>>, %arg14: memref<1x4x256xf32, #tpu.memory_space<vmem>>, %arg15: memref<144x256xf32, #tpu.memory_space<vmem>>, %arg16: memref<12x256xf32, #tpu.memory_space<vmem>>) attributes {dimension_semantics = [#tpu.dimension_semantics<parallel>], iteration_bounds = array<i64: 2>, scalar_prefetch = 0 : i64, scratch_operands = 2 : i64, tpu.core_type = #tpu.core_type<tc>, window_params = [{transform_indices = @transform_0, window_bounds = array<i64: 1, 16, 64>}, {transform_indices = @transform_1, window_bounds = array<i64: 1, 4, 256>}, {transform_indices = @transform_2, window_bounds = array<i64: 1, 4, 256>}, {pipeline_mode = #tpu.pipeline_mode<synchronous>, transform_indices = @transform_3, window_bounds = array<i64: 64, 256>}, {pipeline_mode = #tpu.pipeline_mode<synchronous>, transform_indices = @transform_4, window_bounds = array<i64: 9, 256>}, {pipeline_mode = #tpu.pipeline_mode<synchronous>, transform_indices = @transform_5, window_bounds = array<i64: 4, 144>}, {pipeline_mode = #tpu.pipeline_mode<synchronous>, transform_indices = @transform_6, window_bounds = array<i64: 4, 1>}, {pipeline_mode = #tpu.pipeline_mode<synchronous>, transform_indices = @transform_7, window_bounds = array<i64: 4, 108>}, {pipeline_mode = #tpu.pipeline_mode<synchronous>, transform_indices = @transform_8, window_bounds = array<i64: 4, 1>}, {pipeline_mode = #tpu.pipeline_mode<synchronous>, transform_indices = @transform_9, window_bounds = array<i64: 4, 36>}, {pipeline_mode = #tpu.pipeline_mode<synchronous>, transform_indices = @transform_10, window_bounds = array<i64: 4, 1>}, {pipeline_mode = #tpu.pipeline_mode<synchronous>, transform_indices = @transform_11, window_bounds = array<i64: 4, 12>}, {pipeline_mode = #tpu.pipeline_mode<synchronous>, transform_indices = @transform_12, window_bounds = array<i64: 4, 1>}, {transform_indices = @transform_13, window_bounds = array<i64: 1, 4, 256>}]} {
    %c0 = arith.constant 0 : index
    %c0_0 = arith.constant 0 : index
    %0 = vector.load %arg5[%c0, %c0_0] : memref<9x256xf32, #tpu.memory_space<vmem>>, vector<9x256xf32>
    %c0_1 = arith.constant 0 : index
    %c0_2 = arith.constant 0 : index
    %c0_3 = arith.constant 0 : index
    %1 = vector.load %arg1[%c0_1, %c0_2, %c0_3] : memref<1x16x64xbf16, #tpu.memory_space<vmem>>, vector<1x16x64xbf16>
    %2 = vector.shape_cast %1 : vector<1x16x64xbf16> to vector<16x64xbf16>
    %c0_4 = arith.constant 0 : index
    %c0_5 = arith.constant 0 : index
    %3 = vector.load %arg4[%c0_4, %c0_5] : memref<64x256xbf16, #tpu.memory_space<vmem>>, vector<64x256xbf16>
    %cst = arith.constant dense<0.000000e+00> : vector<16x256xf32>
    %4 = tpu.matmul %2, %3, %cst {dimension_numbers = #tpu.dot_dimension_numbers<[1], [0], [0], [1], [0, 0, 1, 1], [], []>} : vector<16x64xbf16>, vector<64x256xbf16>, vector<16x256xf32> -> vector<16x256xf32>
    %cst_6 = arith.constant 0.000000e+00 : f32
    %5 = vector.broadcast %cst_6 : f32 to vector<144x256xf32>
    %c0_7 = arith.constant 0 : index
    %c0_8 = arith.constant 0 : index
    %6 = vector.load %arg15[%c0_7, %c0_8] : memref<144x256xf32, #tpu.memory_space<vmem>>, vector<144x256xf32>
    tpu.vector_store %arg15[%c0_7, %c0_8], %5 {strides = array<i32>} : memref<144x256xf32, #tpu.memory_space<vmem>>, vector<144x256xf32>,
    %7 = vector.extract_strided_slice %4 {offsets = [0, 0], sizes = [16, 239], strides = [1, 1]} : vector<16x256xf32> to vector<16x239xf32>
    %8 = vector.extract_strided_slice %0 {offsets = [0, 17], sizes = [1, 239], strides = [1, 1]} : vector<9x256xf32> to vector<1x239xf32>
    %9 = vector.broadcast %8 : vector<1x239xf32> to vector<16x239xf32>
    %10 = arith.mulf %7, %9 : vector<16x239xf32>
    %c0_9 = arith.constant 0 : index
    %c17 = arith.constant 17 : index
    %11 = vector.load %arg15[%c0_9, %c17] : memref<144x256xf32, #tpu.memory_space<vmem>>, vector<16x239xf32>
    tpu.vector_store %arg15[%c0_9, %c17], %10 {strides = array<i32>} : memref<144x256xf32, #tpu.memory_space<vmem>>, vector<16x239xf32>,
    %12 = vector.extract_strided_slice %4 {offsets = [0, 0], sizes = [16, 240], strides = [1, 1]} : vector<16x256xf32> to vector<16x240xf32>
    %13 = vector.extract_strided_slice %0 {offsets = [1, 16], sizes = [1, 240], strides = [1, 1]} : vector<9x256xf32> to vector<1x240xf32>
    %14 = vector.broadcast %13 : vector<1x240xf32> to vector<16x240xf32>
    %15 = arith.mulf %12, %14 : vector<16x240xf32>
    %c16 = arith.constant 16 : index
    %c16_10 = arith.constant 16 : index
    %16 = vector.load %arg15[%c16, %c16_10] : memref<144x256xf32, #tpu.memory_space<vmem>>, vector<16x240xf32>
    tpu.vector_store %arg15[%c16, %c16_10], %15 {strides = array<i32>} : memref<144x256xf32, #tpu.memory_space<vmem>>, vector<16x240xf32>,
    %17 = vector.extract_strided_slice %4 {offsets = [0, 0], sizes = [16, 241], strides = [1, 1]} : vector<16x256xf32> to vector<16x241xf32>
    %18 = vector.extract_strided_slice %0 {offsets = [2, 15], sizes = [1, 241], strides = [1, 1]} : vector<9x256xf32> to vector<1x241xf32>
    %19 = vector.broadcast %18 : vector<1x241xf32> to vector<16x241xf32>
    %20 = arith.mulf %17, %19 : vector<16x241xf32>
    %c32 = arith.constant 32 : index
    %c15 = arith.constant 15 : index
    %21 = vector.load %arg15[%c32, %c15] : memref<144x256xf32, #tpu.memory_space<vmem>>, vector<16x241xf32>
    tpu.vector_store %arg15[%c32, %c15], %20 {strides = array<i32>} : memref<144x256xf32, #tpu.memory_space<vmem>>, vector<16x241xf32>,
    %22 = vector.extract_strided_slice %4 {offsets = [0, 0], sizes = [16, 255], strides = [1, 1]} : vector<16x256xf32> to vector<16x255xf32>
    %23 = vector.extract_strided_slice %0 {offsets = [3, 1], sizes = [1, 255], strides = [1, 1]} : vector<9x256xf32> to vector<1x255xf32>
    %24 = vector.broadcast %23 : vector<1x255xf32> to vector<16x255xf32>
    %25 = arith.mulf %22, %24 : vector<16x255xf32>
    %c48 = arith.constant 48 : index
    %c1 = arith.constant 1 : index
    %26 = vector.load %arg15[%c48, %c1] : memref<144x256xf32, #tpu.memory_space<vmem>>, vector<16x255xf32>
    tpu.vector_store %arg15[%c48, %c1], %25 {strides = array<i32>} : memref<144x256xf32, #tpu.memory_space<vmem>>, vector<16x255xf32>,
    %27 = vector.extract_strided_slice %0 {offsets = [4, 0], sizes = [1, 256], strides = [1, 1]} : vector<9x256xf32> to vector<1x256xf32>
    %28 = vector.broadcast %27 : vector<1x256xf32> to vector<16x256xf32>
    %29 = arith.mulf %4, %28 : vector<16x256xf32>
    %c64 = arith.constant 64 : index
    %c0_11 = arith.constant 0 : index
    %30 = vector.load %arg15[%c64, %c0_11] : memref<144x256xf32, #tpu.memory_space<vmem>>, vector<16x256xf32>
    tpu.vector_store %arg15[%c64, %c0_11], %29 {strides = array<i32>} : memref<144x256xf32, #tpu.memory_space<vmem>>, vector<16x256xf32>,
    %31 = vector.extract_strided_slice %4 {offsets = [0, 1], sizes = [16, 255], strides = [1, 1]} : vector<16x256xf32> to vector<16x255xf32>
    %32 = vector.extract_strided_slice %0 {offsets = [5, 0], sizes = [1, 255], strides = [1, 1]} : vector<9x256xf32> to vector<1x255xf32>
    %33 = vector.broadcast %32 : vector<1x255xf32> to vector<16x255xf32>
    %34 = arith.mulf %31, %33 : vector<16x255xf32>
    %c80 = arith.constant 80 : index
    %c0_12 = arith.constant 0 : index
    %35 = vector.load %arg15[%c80, %c0_12] : memref<144x256xf32, #tpu.memory_space<vmem>>, vector<16x255xf32>
    tpu.vector_store %arg15[%c80, %c0_12], %34 {strides = array<i32>} : memref<144x256xf32, #tpu.memory_space<vmem>>, vector<16x255xf32>,
    %36 = vector.extract_strided_slice %4 {offsets = [0, 15], sizes = [16, 241], strides = [1, 1]} : vector<16x256xf32> to vector<16x241xf32>
    %37 = vector.extract_strided_slice %0 {offsets = [6, 0], sizes = [1, 241], strides = [1, 1]} : vector<9x256xf32> to vector<1x241xf32>
    %38 = vector.broadcast %37 : vector<1x241xf32> to vector<16x241xf32>
    %39 = arith.mulf %36, %38 : vector<16x241xf32>
    %c96 = arith.constant 96 : index
    %c0_13 = arith.constant 0 : index
    %40 = vector.load %arg15[%c96, %c0_13] : memref<144x256xf32, #tpu.memory_space<vmem>>, vector<16x241xf32>
    tpu.vector_store %arg15[%c96, %c0_13], %39 {strides = array<i32>} : memref<144x256xf32, #tpu.memory_space<vmem>>, vector<16x241xf32>,
    %41 = vector.extract_strided_slice %4 {offsets = [0, 16], sizes = [16, 240], strides = [1, 1]} : vector<16x256xf32> to vector<16x240xf32>
    %42 = vector.extract_strided_slice %0 {offsets = [7, 0], sizes = [1, 240], strides = [1, 1]} : vector<9x256xf32> to vector<1x240xf32>
    %43 = vector.broadcast %42 : vector<1x240xf32> to vector<16x240xf32>
    %44 = arith.mulf %41, %43 : vector<16x240xf32>
    %c112 = arith.constant 112 : index
    %c0_14 = arith.constant 0 : index
    %45 = vector.load %arg15[%c112, %c0_14] : memref<144x256xf32, #tpu.memory_space<vmem>>, vector<16x240xf32>
    tpu.vector_store %arg15[%c112, %c0_14], %44 {strides = array<i32>} : memref<144x256xf32, #tpu.memory_space<vmem>>, vector<16x240xf32>,
    %46 = vector.extract_strided_slice %4 {offsets = [0, 17], sizes = [16, 239], strides = [1, 1]} : vector<16x256xf32> to vector<16x239xf32>
    %47 = vector.extract_strided_slice %0 {offsets = [8, 0], sizes = [1, 239], strides = [1, 1]} : vector<9x256xf32> to vector<1x239xf32>
    %48 = vector.broadcast %47 : vector<1x239xf32> to vector<16x239xf32>
    %49 = arith.mulf %46, %48 : vector<16x239xf32>
    %c128 = arith.constant 128 : index
    %c0_15 = arith.constant 0 : index
    %50 = vector.load %arg15[%c128, %c0_15] : memref<144x256xf32, #tpu.memory_space<vmem>>, vector<16x239xf32>
    tpu.vector_store %arg15[%c128, %c0_15], %49 {strides = array<i32>} : memref<144x256xf32, #tpu.memory_space<vmem>>, vector<16x239xf32>,
    %c0_16 = arith.constant 0 : index
    %c0_17 = arith.constant 0 : index
    %51 = vector.load %arg15[%c0_16, %c0_17] : memref<144x256xf32, #tpu.memory_space<vmem>>, vector<144x256xf32>
    %52 = arith.truncf %51 : vector<144x256xf32> to vector<144x256xbf16>
    %c0_18 = arith.constant 0 : index
    %c0_19 = arith.constant 0 : index
    %53 = vector.load %arg6[%c0_18, %c0_19] : memref<4x144xbf16, #tpu.memory_space<vmem>>, vector<4x144xbf16>
    %cst_20 = arith.constant dense<0.000000e+00> : vector<4x256xf32>
    %54 = tpu.matmul %53, %52, %cst_20 {dimension_numbers = #tpu.dot_dimension_numbers<[1], [0], [0], [1], [0, 0, 1, 1], [], []>} : vector<4x144xbf16>, vector<144x256xbf16>, vector<4x256xf32> -> vector<4x256xf32>
    %c0_21 = arith.constant 0 : index
    %c0_22 = arith.constant 0 : index
    %55 = vector.load %arg7[%c0_21, %c0_22] : memref<4x1xf32, #tpu.memory_space<vmem>>, vector<4x1xf32>
    %56 = vector.broadcast %55 : vector<4x1xf32> to vector<4x256xf32>
    %57 = arith.addf %54, %56 : vector<4x256xf32>
    %c0_23 = arith.constant 0 : index
    %c0_24 = arith.constant 0 : index
    %c0_25 = arith.constant 0 : index
    %58 = vector.load %arg2[%c0_23, %c0_24, %c0_25] : memref<1x4x256xbf16, #tpu.memory_space<vmem>>, vector<1x4x256xbf16>
    %59 = vector.shape_cast %58 : vector<1x4x256xbf16> to vector<4x256xbf16>
    %60 = arith.extf %59 : vector<4x256xbf16> to vector<4x256xf32>
    %c0_26 = arith.constant 0 : index
    %c0_27 = arith.constant 0 : index
    %61 = vector.load %arg16[%c0_26, %c0_27] : memref<12x256xf32, #tpu.memory_space<vmem>>, vector<4x256xf32>
    tpu.vector_store %arg16[%c0_26, %c0_27], %60 {strides = array<i32>} : memref<12x256xf32, #tpu.memory_space<vmem>>, vector<4x256xf32>,
    %c4 = arith.constant 4 : index
    %c0_28 = arith.constant 0 : index
    %62 = vector.load %arg16[%c4, %c0_28] : memref<12x256xf32, #tpu.memory_space<vmem>>, vector<4x256xf32>
    tpu.vector_store %arg16[%c4, %c0_28], %57 {strides = array<i32>} : memref<12x256xf32, #tpu.memory_space<vmem>>, vector<4x256xf32>,
    %c0_29 = arith.constant 0 : index
    %c0_30 = arith.constant 0 : index
    %c0_31 = arith.constant 0 : index
    %63 = vector.load %arg3[%c0_29, %c0_30, %c0_31] : memref<1x4x256xbf16, #tpu.memory_space<vmem>>, vector<1x4x256xbf16>
    %64 = vector.shape_cast %63 : vector<1x4x256xbf16> to vector<4x256xbf16>
    %65 = arith.extf %64 : vector<4x256xbf16> to vector<4x256xf32>
    %c8 = arith.constant 8 : index
    %c0_32 = arith.constant 0 : index
    %66 = vector.load %arg16[%c8, %c0_32] : memref<12x256xf32, #tpu.memory_space<vmem>>, vector<4x256xf32>
    tpu.vector_store %arg16[%c8, %c0_32], %65 {strides = array<i32>} : memref<12x256xf32, #tpu.memory_space<vmem>>, vector<4x256xf32>,
    %c0_33 = arith.constant 0 : index
    %c0_34 = arith.constant 0 : index
    %67 = vector.load %arg16[%c0_33, %c0_34] : memref<12x256xf32, #tpu.memory_space<vmem>>, vector<12x256xf32>
    %cst_35 = arith.constant 0.000000e+00 : f32
    %68 = vector.broadcast %cst_35 : f32 to vector<108x256xf32>
    %c0_36 = arith.constant 0 : index
    %c0_37 = arith.constant 0 : index
    %69 = vector.load %arg15[%c0_36, %c0_37] : memref<144x256xf32, #tpu.memory_space<vmem>>, vector<108x256xf32>
    tpu.vector_store %arg15[%c0_36, %c0_37], %68 {strides = array<i32>} : memref<144x256xf32, #tpu.memory_space<vmem>>, vector<108x256xf32>,
    %70 = vector.extract_strided_slice %67 {offsets = [0, 0], sizes = [12, 239], strides = [1, 1]} : vector<12x256xf32> to vector<12x239xf32>
    %71 = vector.extract_strided_slice %0 {offsets = [0, 17], sizes = [1, 239], strides = [1, 1]} : vector<9x256xf32> to vector<1x239xf32>
    %72 = vector.broadcast %71 : vector<1x239xf32> to vector<12x239xf32>
    %73 = arith.mulf %70, %72 : vector<12x239xf32>
    %c0_38 = arith.constant 0 : index
    %c17_39 = arith.constant 17 : index
    %74 = vector.load %arg15[%c0_38, %c17_39] : memref<144x256xf32, #tpu.memory_space<vmem>>, vector<12x239xf32>
    tpu.vector_store %arg15[%c0_38, %c17_39], %73 {strides = array<i32>} : memref<144x256xf32, #tpu.memory_space<vmem>>, vector<12x239xf32>,
    %75 = vector.extract_strided_slice %67 {offsets = [0, 0], sizes = [12, 240], strides = [1, 1]} : vector<12x256xf32> to vector<12x240xf32>
    %76 = vector.extract_strided_slice %0 {offsets = [1, 16], sizes = [1, 240], strides = [1, 1]} : vector<9x256xf32> to vector<1x240xf32>
    %77 = vector.broadcast %76 : vector<1x240xf32> to vector<12x240xf32>
    %78 = arith.mulf %75, %77 : vector<12x240xf32>
    %c12 = arith.constant 12 : index
    %c16_40 = arith.constant 16 : index
    %79 = vector.load %arg15[%c12, %c16_40] : memref<144x256xf32, #tpu.memory_space<vmem>>, vector<12x240xf32>
    tpu.vector_store %arg15[%c12, %c16_40], %78 {strides = array<i32>} : memref<144x256xf32, #tpu.memory_space<vmem>>, vector<12x240xf32>,
    %80 = vector.extract_strided_slice %67 {offsets = [0, 0], sizes = [12, 241], strides = [1, 1]} : vector<12x256xf32> to vector<12x241xf32>
    %81 = vector.extract_strided_slice %0 {offsets = [2, 15], sizes = [1, 241], strides = [1, 1]} : vector<9x256xf32> to vector<1x241xf32>
    %82 = vector.broadcast %81 : vector<1x241xf32> to vector<12x241xf32>
    %83 = arith.mulf %80, %82 : vector<12x241xf32>
    %c24 = arith.constant 24 : index
    %c15_41 = arith.constant 15 : index
    %84 = vector.load %arg15[%c24, %c15_41] : memref<144x256xf32, #tpu.memory_space<vmem>>, vector<12x241xf32>
    tpu.vector_store %arg15[%c24, %c15_41], %83 {strides = array<i32>} : memref<144x256xf32, #tpu.memory_space<vmem>>, vector<12x241xf32>,
    %85 = vector.extract_strided_slice %67 {offsets = [0, 0], sizes = [12, 255], strides = [1, 1]} : vector<12x256xf32> to vector<12x255xf32>
    %86 = vector.extract_strided_slice %0 {offsets = [3, 1], sizes = [1, 255], strides = [1, 1]} : vector<9x256xf32> to vector<1x255xf32>
    %87 = vector.broadcast %86 : vector<1x255xf32> to vector<12x255xf32>
    %88 = arith.mulf %85, %87 : vector<12x255xf32>
    %c36 = arith.constant 36 : index
    %c1_42 = arith.constant 1 : index
    %89 = vector.load %arg15[%c36, %c1_42] : memref<144x256xf32, #tpu.memory_space<vmem>>, vector<12x255xf32>
    tpu.vector_store %arg15[%c36, %c1_42], %88 {strides = array<i32>} : memref<144x256xf32, #tpu.memory_space<vmem>>, vector<12x255xf32>,
    %90 = vector.extract_strided_slice %0 {offsets = [4, 0], sizes = [1, 256], strides = [1, 1]} : vector<9x256xf32> to vector<1x256xf32>
    %91 = vector.broadcast %90 : vector<1x256xf32> to vector<12x256xf32>
    %92 = arith.mulf %67, %91 : vector<12x256xf32>
    %c48_43 = arith.constant 48 : index
    %c0_44 = arith.constant 0 : index
    %93 = vector.load %arg15[%c48_43, %c0_44] : memref<144x256xf32, #tpu.memory_space<vmem>>, vector<12x256xf32>
    tpu.vector_store %arg15[%c48_43, %c0_44], %92 {strides = array<i32>} : memref<144x256xf32, #tpu.memory_space<vmem>>, vector<12x256xf32>,
    %94 = vector.extract_strided_slice %67 {offsets = [0, 1], sizes = [12, 255], strides = [1, 1]} : vector<12x256xf32> to vector<12x255xf32>
    %95 = vector.extract_strided_slice %0 {offsets = [5, 0], sizes = [1, 255], strides = [1, 1]} : vector<9x256xf32> to vector<1x255xf32>
    %96 = vector.broadcast %95 : vector<1x255xf32> to vector<12x255xf32>
    %97 = arith.mulf %94, %96 : vector<12x255xf32>
    %c60 = arith.constant 60 : index
    %c0_45 = arith.constant 0 : index
    %98 = vector.load %arg15[%c60, %c0_45] : memref<144x256xf32, #tpu.memory_space<vmem>>, vector<12x255xf32>
    tpu.vector_store %arg15[%c60, %c0_45], %97 {strides = array<i32>} : memref<144x256xf32, #tpu.memory_space<vmem>>, vector<12x255xf32>,
    %99 = vector.extract_strided_slice %67 {offsets = [0, 15], sizes = [12, 241], strides = [1, 1]} : vector<12x256xf32> to vector<12x241xf32>
    %100 = vector.extract_strided_slice %0 {offsets = [6, 0], sizes = [1, 241], strides = [1, 1]} : vector<9x256xf32> to vector<1x241xf32>
    %101 = vector.broadcast %100 : vector<1x241xf32> to vector<12x241xf32>
    %102 = arith.mulf %99, %101 : vector<12x241xf32>
    %c72 = arith.constant 72 : index
    %c0_46 = arith.constant 0 : index
    %103 = vector.load %arg15[%c72, %c0_46] : memref<144x256xf32, #tpu.memory_space<vmem>>, vector<12x241xf32>
    tpu.vector_store %arg15[%c72, %c0_46], %102 {strides = array<i32>} : memref<144x256xf32, #tpu.memory_space<vmem>>, vector<12x241xf32>,
    %104 = vector.extract_strided_slice %67 {offsets = [0, 16], sizes = [12, 240], strides = [1, 1]} : vector<12x256xf32> to vector<12x240xf32>
    %105 = vector.extract_strided_slice %0 {offsets = [7, 0], sizes = [1, 240], strides = [1, 1]} : vector<9x256xf32> to vector<1x240xf32>
    %106 = vector.broadcast %105 : vector<1x240xf32> to vector<12x240xf32>
    %107 = arith.mulf %104, %106 : vector<12x240xf32>
    %c84 = arith.constant 84 : index
    %c0_47 = arith.constant 0 : index
    %108 = vector.load %arg15[%c84, %c0_47] : memref<144x256xf32, #tpu.memory_space<vmem>>, vector<12x240xf32>
    tpu.vector_store %arg15[%c84, %c0_47], %107 {strides = array<i32>} : memref<144x256xf32, #tpu.memory_space<vmem>>, vector<12x240xf32>,
    %109 = vector.extract_strided_slice %67 {offsets = [0, 17], sizes = [12, 239], strides = [1, 1]} : vector<12x256xf32> to vector<12x239xf32>
    %110 = vector.extract_strided_slice %0 {offsets = [8, 0], sizes = [1, 239], strides = [1, 1]} : vector<9x256xf32> to vector<1x239xf32>
    %111 = vector.broadcast %110 : vector<1x239xf32> to vector<12x239xf32>
    %112 = arith.mulf %109, %111 : vector<12x239xf32>
    %c96_48 = arith.constant 96 : index
    %c0_49 = arith.constant 0 : index
    %113 = vector.load %arg15[%c96_48, %c0_49] : memref<144x256xf32, #tpu.memory_space<vmem>>, vector<12x239xf32>
    tpu.vector_store %arg15[%c96_48, %c0_49], %112 {strides = array<i32>} : memref<144x256xf32, #tpu.memory_space<vmem>>, vector<12x239xf32>,
    %c0_50 = arith.constant 0 : index
    %c0_51 = arith.constant 0 : index
    %114 = vector.load %arg15[%c0_50, %c0_51] : memref<144x256xf32, #tpu.memory_space<vmem>>, vector<108x256xf32>
    %115 = arith.truncf %114 : vector<108x256xf32> to vector<108x256xbf16>
    %c0_52 = arith.constant 0 : index
    %c0_53 = arith.constant 0 : index
    %116 = vector.load %arg8[%c0_52, %c0_53] : memref<4x108xbf16, #tpu.memory_space<vmem>>, vector<4x108xbf16>
    %cst_54 = arith.constant dense<0.000000e+00> : vector<4x256xf32>
    %117 = tpu.matmul %116, %115, %cst_54 {dimension_numbers = #tpu.dot_dimension_numbers<[1], [0], [0], [1], [0, 0, 1, 1], [], []>} : vector<4x108xbf16>, vector<108x256xbf16>, vector<4x256xf32> -> vector<4x256xf32>
    %c0_55 = arith.constant 0 : index
    %c0_56 = arith.constant 0 : index
    %118 = vector.load %arg9[%c0_55, %c0_56] : memref<4x1xf32, #tpu.memory_space<vmem>>, vector<4x1xf32>
    %119 = vector.broadcast %118 : vector<4x1xf32> to vector<4x256xf32>
    %120 = arith.addf %117, %119 : vector<4x256xf32>
    %cst_57 = arith.constant 0.000000e+00 : f32
    %121 = vector.broadcast %cst_57 : f32 to vector<4x256xf32>
    %122 = arith.cmpf oge, %120, %121 : vector<4x256xf32>
    %cst_58 = arith.constant 2.000000e-01 : f32
    %123 = vector.broadcast %cst_58 : f32 to vector<4x256xf32>
    %124 = arith.mulf %120, %123 : vector<4x256xf32>
    %125 = arith.select %122, %120, %124 : vector<4x256xi1>, vector<4x256xf32>
    %cst_59 = arith.constant 0.000000e+00 : f32
    %126 = vector.broadcast %cst_59 : f32 to vector<36x256xf32>
    %c0_60 = arith.constant 0 : index
    %c0_61 = arith.constant 0 : index
    %127 = vector.load %arg15[%c0_60, %c0_61] : memref<144x256xf32, #tpu.memory_space<vmem>>, vector<36x256xf32>
    tpu.vector_store %arg15[%c0_60, %c0_61], %126 {strides = array<i32>} : memref<144x256xf32, #tpu.memory_space<vmem>>, vector<36x256xf32>,
    %128 = vector.extract_strided_slice %125 {offsets = [0, 0], sizes = [4, 239], strides = [1, 1]} : vector<4x256xf32> to vector<4x239xf32>
    %129 = vector.extract_strided_slice %0 {offsets = [0, 17], sizes = [1, 239], strides = [1, 1]} : vector<9x256xf32> to vector<1x239xf32>
    %130 = vector.broadcast %129 : vector<1x239xf32> to vector<4x239xf32>
    %131 = arith.mulf %128, %130 : vector<4x239xf32>
    %c0_62 = arith.constant 0 : index
    %c17_63 = arith.constant 17 : index
    %132 = vector.load %arg15[%c0_62, %c17_63] : memref<144x256xf32, #tpu.memory_space<vmem>>, vector<4x239xf32>
    tpu.vector_store %arg15[%c0_62, %c17_63], %131 {strides = array<i32>} : memref<144x256xf32, #tpu.memory_space<vmem>>, vector<4x239xf32>,
    %133 = vector.extract_strided_slice %125 {offsets = [0, 0], sizes = [4, 240], strides = [1, 1]} : vector<4x256xf32> to vector<4x240xf32>
    %134 = vector.extract_strided_slice %0 {offsets = [1, 16], sizes = [1, 240], strides = [1, 1]} : vector<9x256xf32> to vector<1x240xf32>
    %135 = vector.broadcast %134 : vector<1x240xf32> to vector<4x240xf32>
    %136 = arith.mulf %133, %135 : vector<4x240xf32>
    %c4_64 = arith.constant 4 : index
    %c16_65 = arith.constant 16 : index
    %137 = vector.load %arg15[%c4_64, %c16_65] : memref<144x256xf32, #tpu.memory_space<vmem>>, vector<4x240xf32>
    tpu.vector_store %arg15[%c4_64, %c16_65], %136 {strides = array<i32>} : memref<144x256xf32, #tpu.memory_space<vmem>>, vector<4x240xf32>,
    %138 = vector.extract_strided_slice %125 {offsets = [0, 0], sizes = [4, 241], strides = [1, 1]} : vector<4x256xf32> to vector<4x241xf32>
    %139 = vector.extract_strided_slice %0 {offsets = [2, 15], sizes = [1, 241], strides = [1, 1]} : vector<9x256xf32> to vector<1x241xf32>
    %140 = vector.broadcast %139 : vector<1x241xf32> to vector<4x241xf32>
    %141 = arith.mulf %138, %140 : vector<4x241xf32>
    %c8_66 = arith.constant 8 : index
    %c15_67 = arith.constant 15 : index
    %142 = vector.load %arg15[%c8_66, %c15_67] : memref<144x256xf32, #tpu.memory_space<vmem>>, vector<4x241xf32>
    tpu.vector_store %arg15[%c8_66, %c15_67], %141 {strides = array<i32>} : memref<144x256xf32, #tpu.memory_space<vmem>>, vector<4x241xf32>,
    %143 = vector.extract_strided_slice %125 {offsets = [0, 0], sizes = [4, 255], strides = [1, 1]} : vector<4x256xf32> to vector<4x255xf32>
    %144 = vector.extract_strided_slice %0 {offsets = [3, 1], sizes = [1, 255], strides = [1, 1]} : vector<9x256xf32> to vector<1x255xf32>
    %145 = vector.broadcast %144 : vector<1x255xf32> to vector<4x255xf32>
    %146 = arith.mulf %143, %145 : vector<4x255xf32>
    %c12_68 = arith.constant 12 : index
    %c1_69 = arith.constant 1 : index
    %147 = vector.load %arg15[%c12_68, %c1_69] : memref<144x256xf32, #tpu.memory_space<vmem>>, vector<4x255xf32>
    tpu.vector_store %arg15[%c12_68, %c1_69], %146 {strides = array<i32>} : memref<144x256xf32, #tpu.memory_space<vmem>>, vector<4x255xf32>,
    %148 = vector.extract_strided_slice %0 {offsets = [4, 0], sizes = [1, 256], strides = [1, 1]} : vector<9x256xf32> to vector<1x256xf32>
    %149 = vector.broadcast %148 : vector<1x256xf32> to vector<4x256xf32>
    %150 = arith.mulf %125, %149 : vector<4x256xf32>
    %c16_70 = arith.constant 16 : index
    %c0_71 = arith.constant 0 : index
    %151 = vector.load %arg15[%c16_70, %c0_71] : memref<144x256xf32, #tpu.memory_space<vmem>>, vector<4x256xf32>
    tpu.vector_store %arg15[%c16_70, %c0_71], %150 {strides = array<i32>} : memref<144x256xf32, #tpu.memory_space<vmem>>, vector<4x256xf32>,
    %152 = vector.extract_strided_slice %125 {offsets = [0, 1], sizes = [4, 255], strides = [1, 1]} : vector<4x256xf32> to vector<4x255xf32>
    %153 = vector.extract_strided_slice %0 {offsets = [5, 0], sizes = [1, 255], strides = [1, 1]} : vector<9x256xf32> to vector<1x255xf32>
    %154 = vector.broadcast %153 : vector<1x255xf32> to vector<4x255xf32>
    %155 = arith.mulf %152, %154 : vector<4x255xf32>
    %c20 = arith.constant 20 : index
    %c0_72 = arith.constant 0 : index
    %156 = vector.load %arg15[%c20, %c0_72] : memref<144x256xf32, #tpu.memory_space<vmem>>, vector<4x255xf32>
    tpu.vector_store %arg15[%c20, %c0_72], %155 {strides = array<i32>} : memref<144x256xf32, #tpu.memory_space<vmem>>, vector<4x255xf32>,
    %157 = vector.extract_strided_slice %125 {offsets = [0, 15], sizes = [4, 241], strides = [1, 1]} : vector<4x256xf32> to vector<4x241xf32>
    %158 = vector.extract_strided_slice %0 {offsets = [6, 0], sizes = [1, 241], strides = [1, 1]} : vector<9x256xf32> to vector<1x241xf32>
    %159 = vector.broadcast %158 : vector<1x241xf32> to vector<4x241xf32>
    %160 = arith.mulf %157, %159 : vector<4x241xf32>
    %c24_73 = arith.constant 24 : index
    %c0_74 = arith.constant 0 : index
    %161 = vector.load %arg15[%c24_73, %c0_74] : memref<144x256xf32, #tpu.memory_space<vmem>>, vector<4x241xf32>
    tpu.vector_store %arg15[%c24_73, %c0_74], %160 {strides = array<i32>} : memref<144x256xf32, #tpu.memory_space<vmem>>, vector<4x241xf32>,
    %162 = vector.extract_strided_slice %125 {offsets = [0, 16], sizes = [4, 240], strides = [1, 1]} : vector<4x256xf32> to vector<4x240xf32>
    %163 = vector.extract_strided_slice %0 {offsets = [7, 0], sizes = [1, 240], strides = [1, 1]} : vector<9x256xf32> to vector<1x240xf32>
    %164 = vector.broadcast %163 : vector<1x240xf32> to vector<4x240xf32>
    %165 = arith.mulf %162, %164 : vector<4x240xf32>
    %c28 = arith.constant 28 : index
    %c0_75 = arith.constant 0 : index
    %166 = vector.load %arg15[%c28, %c0_75] : memref<144x256xf32, #tpu.memory_space<vmem>>, vector<4x240xf32>
    tpu.vector_store %arg15[%c28, %c0_75], %165 {strides = array<i32>} : memref<144x256xf32, #tpu.memory_space<vmem>>, vector<4x240xf32>,
    %167 = vector.extract_strided_slice %125 {offsets = [0, 17], sizes = [4, 239], strides = [1, 1]} : vector<4x256xf32> to vector<4x239xf32>
    %168 = vector.extract_strided_slice %0 {offsets = [8, 0], sizes = [1, 239], strides = [1, 1]} : vector<9x256xf32> to vector<1x239xf32>
    %169 = vector.broadcast %168 : vector<1x239xf32> to vector<4x239xf32>
    %170 = arith.mulf %167, %169 : vector<4x239xf32>
    %c32_76 = arith.constant 32 : index
    %c0_77 = arith.constant 0 : index
    %171 = vector.load %arg15[%c32_76, %c0_77] : memref<144x256xf32, #tpu.memory_space<vmem>>, vector<4x239xf32>
    tpu.vector_store %arg15[%c32_76, %c0_77], %170 {strides = array<i32>} : memref<144x256xf32, #tpu.memory_space<vmem>>, vector<4x239xf32>,
    %c0_78 = arith.constant 0 : index
    %c0_79 = arith.constant 0 : index
    %172 = vector.load %arg15[%c0_78, %c0_79] : memref<144x256xf32, #tpu.memory_space<vmem>>, vector<36x256xf32>
    %173 = arith.truncf %172 : vector<36x256xf32> to vector<36x256xbf16>
    %c0_80 = arith.constant 0 : index
    %c0_81 = arith.constant 0 : index
    %174 = vector.load %arg10[%c0_80, %c0_81] : memref<4x36xbf16, #tpu.memory_space<vmem>>, vector<4x36xbf16>
    %cst_82 = arith.constant dense<0.000000e+00> : vector<4x256xf32>
    %175 = tpu.matmul %174, %173, %cst_82 {dimension_numbers = #tpu.dot_dimension_numbers<[1], [0], [0], [1], [0, 0, 1, 1], [], []>} : vector<4x36xbf16>, vector<36x256xbf16>, vector<4x256xf32> -> vector<4x256xf32>
    %c0_83 = arith.constant 0 : index
    %c0_84 = arith.constant 0 : index
    %176 = vector.load %arg11[%c0_83, %c0_84] : memref<4x1xf32, #tpu.memory_space<vmem>>, vector<4x1xf32>
    %177 = vector.broadcast %176 : vector<4x1xf32> to vector<4x256xf32>
    %178 = arith.addf %175, %177 : vector<4x256xf32>
    %cst_85 = arith.constant 0.000000e+00 : f32
    %179 = vector.broadcast %cst_85 : f32 to vector<4x256xf32>
    %180 = arith.cmpf oge, %178, %179 : vector<4x256xf32>
    %cst_86 = arith.constant 2.000000e-01 : f32
    %181 = vector.broadcast %cst_86 : f32 to vector<4x256xf32>
    %182 = arith.mulf %178, %181 : vector<4x256xf32>
    %183 = arith.select %180, %178, %182 : vector<4x256xi1>, vector<4x256xf32>
    %c0_87 = arith.constant 0 : index
    %c0_88 = arith.constant 0 : index
    %184 = vector.load %arg12[%c0_87, %c0_88] : memref<4x12xbf16, #tpu.memory_space<vmem>>, vector<4x12xbf16>
    %185 = arith.truncf %67 : vector<12x256xf32> to vector<12x256xbf16>
    %cst_89 = arith.constant dense<0.000000e+00> : vector<4x256xf32>
    %186 = tpu.matmul %184, %185, %cst_89 {dimension_numbers = #tpu.dot_dimension_numbers<[1], [0], [0], [1], [0, 0, 1, 1], [], []>} : vector<4x12xbf16>, vector<12x256xbf16>, vector<4x256xf32> -> vector<4x256xf32>
    %c0_90 = arith.constant 0 : index
    %c0_91 = arith.constant 0 : index
    %187 = vector.load %arg13[%c0_90, %c0_91] : memref<4x1xf32, #tpu.memory_space<vmem>>, vector<4x1xf32>
    %188 = vector.broadcast %187 : vector<4x1xf32> to vector<4x256xf32>
    %189 = arith.addf %186, %188 : vector<4x256xf32>
    %190 = arith.addf %183, %189 : vector<4x256xf32>
    %c0_92 = arith.constant 0 : index
    %c0_93 = arith.constant 0 : index
    %c0_94 = arith.constant 0 : index
    %191 = vector.load %arg14[%c0_92, %c0_93, %c0_94] : memref<1x4x256xf32, #tpu.memory_space<vmem>>, vector<1x4x256xf32>
    %192 = vector.shape_cast %191 : vector<1x4x256xf32> to vector<4x256xf32>
    %193 = vector.shape_cast %190 : vector<4x256xf32> to vector<1x4x256xf32>
    tpu.vector_store %arg14[%c0_92, %c0_93, %c0_94], %193 {strides = array<i32>} : memref<1x4x256xf32, #tpu.memory_space<vmem>>, vector<1x4x256xf32>,
    return
  }
  func.func @transform_0(%arg0: i32) -> (i32, i32, i32) {
    %c0_i32 = arith.constant 0 : i32
    %c0_i32_0 = arith.constant 0 : i32
    %c0_i32_1 = arith.constant 0 : i32
    return %arg0, %c0_i32, %c0_i32_0 : i32, i32, i32
  }
  func.func @transform_1(%arg0: i32) -> (i32, i32, i32) {
    %c0_i32 = arith.constant 0 : i32
    %c0_i32_0 = arith.constant 0 : i32
    %c0_i32_1 = arith.constant 0 : i32
    return %arg0, %c0_i32, %c0_i32_0 : i32, i32, i32
  }
  func.func @transform_2(%arg0: i32) -> (i32, i32, i32) {
    %c0_i32 = arith.constant 0 : i32
    %c0_i32_0 = arith.constant 0 : i32
    %c0_i32_1 = arith.constant 0 : i32
    return %arg0, %c0_i32, %c0_i32_0 : i32, i32, i32
  }
  func.func @transform_3(%arg0: i32) -> (i32, i32) {
    %c0_i32 = arith.constant 0 : i32
    %c0_i32_0 = arith.constant 0 : i32
    %c0_i32_1 = arith.constant 0 : i32
    return %c0_i32, %c0_i32_0 : i32, i32
  }
  func.func @transform_4(%arg0: i32) -> (i32, i32) {
    %c0_i32 = arith.constant 0 : i32
    %c0_i32_0 = arith.constant 0 : i32
    %c0_i32_1 = arith.constant 0 : i32
    return %c0_i32, %c0_i32_0 : i32, i32
  }
  func.func @transform_5(%arg0: i32) -> (i32, i32) {
    %c0_i32 = arith.constant 0 : i32
    %c0_i32_0 = arith.constant 0 : i32
    %c0_i32_1 = arith.constant 0 : i32
    return %c0_i32, %c0_i32_0 : i32, i32
  }
  func.func @transform_6(%arg0: i32) -> (i32, i32) {
    %c0_i32 = arith.constant 0 : i32
    %c0_i32_0 = arith.constant 0 : i32
    %c0_i32_1 = arith.constant 0 : i32
    return %c0_i32, %c0_i32_0 : i32, i32
  }
  func.func @transform_7(%arg0: i32) -> (i32, i32) {
    %c0_i32 = arith.constant 0 : i32
    %c0_i32_0 = arith.constant 0 : i32
    %c0_i32_1 = arith.constant 0 : i32
    return %c0_i32, %c0_i32_0 : i32, i32
  }
  func.func @transform_8(%arg0: i32) -> (i32, i32) {
    %c0_i32 = arith.constant 0 : i32
    %c0_i32_0 = arith.constant 0 : i32
    %c0_i32_1 = arith.constant 0 : i32
    return %c0_i32, %c0_i32_0 : i32, i32
  }
  func.func @transform_9(%arg0: i32) -> (i32, i32) {
    %c0_i32 = arith.constant 0 : i32
    %c0_i32_0 = arith.constant 0 : i32
    %c0_i32_1 = arith.constant 0 : i32
    return %c0_i32, %c0_i32_0 : i32, i32
  }
  func.func @transform_10(%arg0: i32) -> (i32, i32) {
    %c0_i32 = arith.constant 0 : i32
    %c0_i32_0 = arith.constant 0 : i32
    %c0_i32_1 = arith.constant 0 : i32
    return %c0_i32, %c0_i32_0 : i32, i32
  }
  func.func @transform_11(%arg0: i32) -> (i32, i32) {
    %c0_i32 = arith.constant 0 : i32
    %c0_i32_0 = arith.constant 0 : i32
    %c0_i32_1 = arith.constant 0 : i32
    return %c0_i32, %c0_i32_0 : i32, i32
  }
  func.func @transform_12(%arg0: i32) -> (i32, i32) {
    %c0_i32 = arith.constant 0 : i32
    %c0_i32_0 = arith.constant 0 : i32
    %c0_i32_1 = arith.constant 0 : i32
    return %c0_i32, %c0_i32_0 : i32, i32
  }
  func.func @transform_13(%arg0: i32) -> (i32, i32, i32) {
    %c0_i32 = arith.constant 0 : i32
    %c0_i32_0 = arith.constant 0 : i32
    %c0_i32_1 = arith.constant 0 : i32
    return %arg0, %c0_i32, %c0_i32_0 : i32, i32, i32
  }
}

</mosaic_0001>

<bundles_post_ra>
// kernel: tpu_custom_call.1
= control target key start
LH: loop header
LB: loop body
LE: loop exit
PB: predicated region body
PF: predicated region fallthrough
CT: control target
= control target key end

     0   :  { %s3250_s0 = inlined_call_operand.vmem [shape: bf16[2,16,64], index: 0, kind: input, shape index: {}]   ;;  %s3251_s1 = inlined_call_operand.hbm [shape: bf16[2,4,256], index: 1, kind: input, shape index: {}]   ;;  %s3252_s2 = inlined_call_operand.hbm [shape: bf16[2,4,256], index: 2, kind: input, shape index: {}]   ;;  %s3253_s3 = inlined_call_operand.hbm [shape: bf16[64,256], index: 3, kind: input, shape index: {}]   ;;  %s3254_s4 = inlined_call_operand.hbm [shape: f32[9,256], index: 4, kind: input, shape index: {}]   ;;  %s3255_s5 = inlined_call_operand.vmem [shape: bf16[4,144], index: 5, kind: input, shape index: {}]   ;;  %s3256_s6 = inlined_call_operand.vmem [shape: f32[4,1], index: 6, kind: input, shape index: {}]   ;;  %s3257_s7 = inlined_call_operand.vmem [shape: bf16[4,108], index: 7, kind: input, shape index: {}]   ;;  %s3258_s8 = inlined_call_operand.vmem [shape: f32[4,1], index: 8, kind: input, shape index: {}]   ;;  %s3259_s9 = inlined_call_operand.vmem [shape: bf16[4,36], index: 9, kind: input, shape index: {}]   ;;  %s3260_s10 = inlined_call_operand.vmem [shape: f32[4,1], index: 10, kind: input, shape index: {}]   ;;  %s3261_s11 = inlined_call_operand.vmem [shape: bf16[4,12], index: 11, kind: input, shape index: {}]   ;;  %s3262_s12 = inlined_call_operand.vmem [shape: f32[4,1], index: 12, kind: input, shape index: {}]   ;;  %s3263_s13 = inlined_call_operand.hbm [shape: f32[2,4,256], index: 13, kind: output, shape index: {}]  }
   0x1   :  { %3280 = sst [smem:[#allocation24_spill]] %s3253_s3 }
   0x2   :  { %3281 = sst [smem:[#allocation25_spill]] %s3254_s4 }
   0x3   :  { %3282 = sst [smem:[#allocation26_spill]] %s3259_s9 }
   0x4   :  { %3283 = sst [smem:[#allocation27_spill]] %s3263_s13 }
   0x5   :  { %18 = vsyncpa [#allocation5], 0 }
   0x6   :  { %20 = vsyncpa [#allocation5 + $0x1], 0 }
   0x7   :  { %21 = vsyncpa [#allocation8], 0 }
   0x8   :  { %23 = vsyncpa [#allocation8 + $0x1], 0 }
   0x9   :  { %24 = vsyncpa [#allocation11], 0 }
   0xa   :  { %25 = vsyncpa [#allocation6], 0 }
   0xb   :  { %27 = vsyncpa [#allocation6 + $0x1], 0  ;;  %s2421_s25 = smov 0   ;;  %s2423_s26 = smov 0  }
   0xc   :  { %s2425_s27 = smov 0   ;;  %s2427_s28 = smov 0  }
   0xd LB: > { %3284 = sst [smem:[#allocation18_spill]] %s2318_s25  ;;  %s2442_s29 = sadd.s32 4294967295, %s2330_s28   ;;  %s2330_s28 = sphi %s2427_s28, %s3318_s28   ;;  %s2326_s27 = sphi %s2425_s27, %s3320_s27   ;;  %s2322_s26 = sphi %s2423_s26, %s3322_s26   ;;  %s2318_s25 = sphi %s2421_s25, %s3321_s25  }
   0xe   : > { %3285 = sst [smem:[#allocation19_spill]] %s2326_s27  ;;  %s1997_s30 = sadd.s32 4294967294, %s2330_s28  }
   0xf   : > { %p79_p0 = scmp.ne.s32.totalorder %s2322_s26, %s2318_s25  ;;  %p3264_p1 = scmp.eq.s32.totalorder %s2442_s29, 0 }
  0x10   : > { %p345_p3 = scmp.eq.s32.totalorder %s1997_s30, 1  ;;  %p1998_p5 = scmp.ge.s32.totalorder %s2330_s28, 1 }
  0x11   : > { %p2451_p4 = por %p3264_p1, %p79_p0  ;;  %p352_p7 = scmp.lt.s32.totalorder %s2330_s28, 3 }
  0x12   : > { %p2456_p6 = por %p345_p3, %p79_p0  ;;  %s2332_s17 = smov [#allocation9]  }
  0x13   : > { %s3286_s14 = scalar_select %p2451_p4, 1, 0 }
  0x14   : > { %s3287_s15 = scalar_select %p2456_p6, 1, 0 }
  0x15   : > { %p2461_p8 = pnand %p1998_p5, %p352_p7  ;;  %s364_s18 = sshll.u32 %s2332_s17, 4  ;;  %s365_s18 = int_to_ptr.vmem [resolvable:$true] %s364_s18 }
  0x16   : > { %3288 = sst [smem:[#allocation20_spill]] %s3287_s15  ;;  %s2333_s20 = smov [#allocation10]  }
  0x17   : > { %s3289_s16 = scalar_select %p2461_p8, 1, 0 }
  0x18   : > { %p2059_p9 = pneg %p2461_p8  ;;  %s377_s21 = sshll.u32 %s2333_s20, 4  ;;  %s378_s21 = int_to_ptr.vmem [resolvable:$true] %s377_s21 }
  0x19   : > { %s2157_s22 = scalar_lea.vmem %s365_s18, 1024  ;;  %p2165_p5 = scmp.lt.s32.totalorder %s365_s18, %s365_s18 }
  0x1a   : > { %p2470_p11 = pnand %p2059_p9, %p3264_p1  ;;  %p2158_p13 = scmp.ne.s32.totalorder %s365_s18, %s2157_s22 }
  0x1b   : > { %p2166_p7 = scmp.lt.s32.totalorder %s2157_s22, %s2157_s22 }
  0x1c   : > { %p2148_p12 = pneg %p2470_p11 }
  0x1d   : > { %p2167_p10 = por %p2166_p7, %p2165_p5 }
  0x1e   : > { %p2160_p0 = pnand %p2158_p13, %p2148_p12 }
  0x20   : > { %p2161_p3 = pneg %p2160_p0 }
  0x22   : > { %p2168_p9 = pnand %p2167_p10, %p2161_p3 }
  0x24   : > { %2171 = shalt.err (!%p2168_p9)
}
  0x25   : > { %s2334_s23 = smov 128   ;;  %s2335_s24 = smov 8  }
  0x26   : > { %s3291_s3 = sld [smem:[#allocation24_spill]]  ;;  %s2183_s20 = scalar_lea.vmem %s378_s21, 512 }
  0x27   : > { %p2184_p1 = scmp.ne.s32.totalorder %s378_s21, %s2183_s20  ;;  %p2191_p2 = scmp.lt.s32.totalorder %s378_s21, %s378_s21 }
  0x28   : > { %p2192_p6 = scmp.lt.s32.totalorder %s2183_s20, %s2183_s20 }
  0x29   : > { %p2186_p13 = pnand %p2184_p1, %p2148_p12 }
  0x2a   : > { %p2193_p5 = por %p2192_p6, %p2191_p2 }
  0x2b   : > { %p2187_p0 = pneg %p2186_p13 }
  0x2c   : > { %2062 = dma.hbm_to_vmem [thread:$0]  (!%p2470_p11), %s3291_s3, 1024, %s365_s18, [#allocation8], %s2334_s23, %s2334_s23, %s2335_s24  }
  0x2d   : > { %p2194_p10 = pnand %p2193_p5, %p2187_p0 }
  0x2f   : > { %2197 = shalt.err (!%p2194_p10)
}
  0x30   : > { %s2336_s22 = smov 256   ;;  %s2337_s18 = smov 16  }
  0x31   : > { %s3292_s4 = sld [smem:[#allocation25_spill]]  ;;  %s2493_s30 = sadd.s32 1, %s2330_s28  }
  0x32   : > { %3293 = sst [smem:[#allocation21_spill]] %s2493_s30  ;;  %s63_s17 = ssub.s32 %s2330_s28, %s2493_s30 }
  0x33   : > { %p64_p1 = scmp.eq.s32.totalorder %s63_s17, 0  ;;  %s66_s20 = sadd.s32 1, %s2326_s27 }
  0x34   : > { %p73_p2 = scmp.ne.s32.totalorder %s2326_s27, %s2322_s26  ;;  %p74_p6 = scmp.eq.s32.totalorder %s2330_s28, 0 }
  0x35   : > { %s2502_s3 = scalar_select %p64_p1, %s2326_s27, %s66_s20  }
  0x36   : > { %p75_p12 = por %p74_p6, %p73_p2  ;;  %p3295_p3 = scmp.eq.s32.totalorder %s2442_s29, 1 }
  0x37   : > { %2065 = dma.hbm_to_vmem [thread:$0]  (!%p2470_p11), %s3292_s4, 512, %s378_s21, [#allocation11], %s2336_s22, %s2336_s22, %s2337_s18  }
  0x38   : > { %3294 = sst [smem:[#allocation22_spill]] %s2502_s3  ;;  %p2506_p7 = por %p3295_p3, %p73_p2 }
  0x39   : > { %p2079_p9 = scmp.lt.s32.totalorder %s2330_s28, 2  ;;  %s423_s19 = sand.u32 1, %s2326_s27  }
  0x3a   : > { %s3296_s15 = scalar_select %p2506_p7, 1, 0 }
  0x3b   : > { %s2512_s21 = sshll.u32 %s423_s19, 2  ;;  %s2041_s22 = sshll.u32 %s2330_s28, 6 }
  0x3c   : > { %3297 = sst [smem:[#allocation23_spill]] %s3296_s15  ;;  %s2518_s24 = scalar_lea.hbm %s3251_s1, %s2041_s22 }
  0x3d   : > { %s427_s17 = scalar_lea.vmem [#allocation4], %s2512_s21  ;;  %p2523_p11 = pnand %p2079_p9, %p75_p12 }
  0x3e   : > { %s435_s20 = sshll.u32 %s427_s17, 4  ;;  %s2530_s30 = scalar_lea.hbm %s3252_s2, %s2041_s22  ;;  %s2521_s20 = int_to_ptr.vmem [resolvable:$true] %s435_s20 }
  0x3f   : > { %s442_s18 = sand.u32 1, %s2330_s28   ;;  %s424_s23 = scalar_lea.sflag [#allocation5], %s423_s19 }
  0x40   : > { %s2198_s25 = scalar_lea.hbm %s2518_s24, 64  ;;  %p2200_p0 = pneg %p2523_p11 }
  0x41   : > { %p2199_p13 = scmp.ne.s32.totalorder %s2518_s24, %s2198_s25  ;;  %s2203_s15 = scalar_lea.hbm %s3251_s1, 128 }
  0x42   : > { %p2204_p1 = scmp.lt.s32.totalorder %s2518_s24, %s3251_s1  ;;  %p2205_p2 = scmp.lt.s32.totalorder %s2203_s15, %s2198_s25 }
  0x43   : > { %p2201_p5 = pnand %p2200_p0, %p2199_p13 }
  0x44   : > { %p2206_p6 = por %p2205_p2, %p2204_p1 }
  0x45   : > { %p2202_p10 = pneg %p2201_p5 }
  0x47   : > { %p2207_p12 = pnand %p2206_p6, %p2202_p10 }
  0x49   : > { %2210 = shalt.err (!%p2207_p12)
}
  0x4a   : > { %s2211_s27 = scalar_lea.vmem %s2521_s20, 64  ;;  %s2338_s13 = smov [#allocation4]  }
  0x4b   : > { %p2212_p3 = scmp.ne.s32.totalorder %s2521_s20, %s2211_s27  ;;  %s2216_s19 = sshll.u32 %s2338_s13, 4  ;;  %s2217_s19 = int_to_ptr.vmem [resolvable:$false] %s2216_s19 }
  0x4c   : > { %s2218_s22 = scalar_lea.vmem %s2217_s19, 128  ;;  %p2219_p5 = scmp.lt.s32.totalorder %s2521_s20, %s2217_s19 }
  0x4d   : > { %p2214_p9 = pnand %p2212_p3, %p2200_p0  ;;  %p2220_p7 = scmp.lt.s32.totalorder %s2218_s22, %s2211_s27 }
  0x4f   : > { %p2215_p13 = pneg %p2214_p9  ;;  %p2221_p4 = por %p2220_p7, %p2219_p5 }
  0x51   : > { %p2222_p1 = pnand %p2221_p4, %p2215_p13 }
  0x53   : > { %2225 = shalt.err (!%p2222_p1)
}
  0x54   : > { %2069 = dma.hbm_to_vmem [thread:$0]  (!%p2523_p11), %s2518_s24, 64, %s2521_s20, %s424_s23  }
  0x55   : > { %s446_s9 = scalar_lea.vmem [#allocation7], %s2512_s21  ;;  %s443_s15 = scalar_lea.sflag [#allocation8], %s442_s18 }
  0x56   : > { %s454_s25 = sshll.u32 %s446_s9, 4  ;;  %s2226_s17 = scalar_lea.hbm %s2530_s30, 64  ;;  %s455_s25 = int_to_ptr.vmem [resolvable:$true] %s454_s25 }
  0x57   : > { %p2227_p7 = scmp.ne.s32.totalorder %s2530_s30, %s2226_s17  ;;  %s2231_s13 = scalar_lea.hbm %s3252_s2, 128 }
  0x58   : > { %p2232_p2 = scmp.lt.s32.totalorder %s2530_s30, %s3252_s2  ;;  %p2233_p6 = scmp.lt.s32.totalorder %s2231_s13, %s2226_s17 }
  0x59   : > { %p2229_p4 = pnand %p2227_p7, %p2200_p0 }
  0x5a   : > { %p2234_p12 = por %p2233_p6, %p2232_p2 }
  0x5b   : > { %p2230_p10 = pneg %p2229_p4 }
  0x5d   : > { %p2235_p3 = pnand %p2234_p12, %p2230_p10 }
  0x5f   : > { %2238 = shalt.err (!%p2235_p3)
}
  0x60   : > { %s2239_s21 = scalar_lea.vmem %s455_s25, 64  ;;  %s2339_s24 = smov [#allocation7]  }
  0x61   : > { %p2240_p9 = scmp.ne.s32.totalorder %s455_s25, %s2239_s21  ;;  %s2244_s20 = sshll.u32 %s2339_s24, 4  ;;  %s2245_s20 = int_to_ptr.vmem [resolvable:$false] %s2244_s20 }
  0x62   : > { %s2246_s18 = scalar_lea.vmem %s2245_s20, 128  ;;  %p2247_p1 = scmp.lt.s32.totalorder %s455_s25, %s2245_s20 }
  0x63   : > { %p2242_p13 = pnand %p2240_p9, %p2200_p0  ;;  %p2248_p7 = scmp.lt.s32.totalorder %s2246_s18, %s2239_s21 }
  0x65   : > { %p2243_p5 = pneg %p2242_p13  ;;  %p2249_p4 = por %p2248_p7, %p2247_p1 }
  0x67   : > { %p2250_p8 = pnand %p2249_p4, %p2243_p5 }
  0x69   : > { %2253 = shalt.err (!%p2250_p8)
}
  0x6a   : > { %2072 = dma.hbm_to_vmem [thread:$0]  (!%p2523_p11), %s2530_s30, 64, %s455_s25, %s443_s15  }
  0x6b   : > { %p3299_p10 = scmp.ne.s32.totalorder %s3289_s16, 0 }
  0x6c   : > { %s2581_s23 = sand.u32 (!%p3299_p10), 1, %s2322_s26   ;;  %p3300_p0 = scmp.ne.s32.totalorder (!%p3299_p10), %s3286_s14, 0 }
  0x6d   : > { %463 = sbr.rel (%p3299_p10) target bundleno = 1494 (0x5d6), region = 72  ;;  %s2009_s9 = sshll.u32 (!%p3299_p10), %s2581_s23, 2 }
  0x6e   : > { %s466_s17 = scalar_lea.sflag (!%p3299_p10), [#allocation5], %s2581_s23  ;;  %s2585_s3 = scalar_lea.vmem (!%p3299_p10), [#allocation4], %s2009_s9 }
  0x72   : > { %2297 = dma.done.wait (%p3300_p0), %s466_s17, 64  }
  0x73   : > { %2299 = vsyncadd (%p3300_p0), %s466_s17, 4294967232  ;;  %s474_s4 = sand.u32 1, %s2442_s29   ;;  %s2592_s30 = scalar_lea.vmem [#allocation7], %s2009_s9 }
  0x74   : > { %s475_s16 = scalar_lea.sflag [#allocation8], %s474_s4 }
  0x75   : > { %2301 = dma.done.wait (%p3300_p0), %s475_s16, 64  }
  0x76   : > { %2303 = vsyncadd (%p3300_p0), %s475_s16, 4294967232  ;;  %p3301_p8 = scmp.eq.s32.totalorder %s2442_s29, 0 }
  0x78   : > { %2305 = dma.done.wait (%p3301_p8), [#allocation8], 1024   ;;  %p3302_p11 = pmov %p3301_p8 }
  0x79   : > { %p3303_p2 = pmov %p3301_p8 }
  0x7a   : > { %2307 = vsyncadd (%p3302_p11), [#allocation8], 4294966272 }
  0x7b   : > { %2309 = dma.done.wait (%p3303_p2), [#allocation11], 512   ;;  %p3304_p6 = pmov %p3303_p2 }
  0x7c   : > { %p539_p12 = scmp.lt.s32.totalorder %s2442_s29, 1  ;;  %v2340_v0 = vmov 0   ;;  %v687_v1 = vlaneseq  ;;  %v2133_v3 = vld [vmem:[#allocation9 + $0x34] ss:$8 sps:$4 sm:$0xff]   ;;  %v2135_v4 = vld [vmem:[#allocation9 + $0x30] ss:$8 sps:$4 sm:$0xff]  }
  0x7d   : > { %2311 = vsyncadd (%p3304_p6), [#allocation11], 4294966784  ;;  %640 = vmatprep.mubr.bf16.mxu0 %v2340_v0  ;;  %2131 = vset.pattern.permute.xlu0 %v2340_v0  ;;  %v2136_v5 = vld [vmem:[#allocation9 + $0x24] ss:$8 sps:$4 sm:$0xff]   ;;  %v2138_v6 = vld [vmem:[#allocation9 + $0x20] ss:$8 sps:$4 sm:$0xff]  }
  0x7e   : > { %2132 = vset.pattern.permute.xlu1 %v2340_v0  ;;  %s540_s14 = scalar_select %p539_p12, %s2442_s29, 1  ;;  %v2611_v2 = vshrl.u32 %v687_v1, 7  ;;  %616 = vmatprep.subr.bf16.mxu0 %v2133_v3  ;;  %v2139_v10 = vld [vmem:[#allocation9 + $0x14] ss:$8 sps:$4 sm:$0xff]   ;;  %v545_v11 = vld [vmem:[#allocation10] sm:$0xff]  ;;  %v546_v12 = vld [vmem:[#allocation10 + $0x8] sm:$0xff] }
  0x7f   : > { %617 = vmatpush1.bf16.msra.mxu0 %v2135_v4  ;;  %v2141_v13 = vld [vmem:[#allocation9 + $0x10] ss:$8 sps:$4 sm:$0xff]   ;;  %v2142_v18 = vld [vmem:[#allocation9 + $0x4] ss:$8 sps:$4 sm:$0xff]   ;;  %s2341_s19 = smov 16   ;;  %s2342_s22 = smov 15  }
  0x80   : > { %s2043_s25 = sshll.u32 %s540_s14, 3  ;;  %v873_v7 = vsub.s32 4, %v2611_v2  ;;  %v975_v8 = vsub.s32 7, %v2611_v2  ;;  %v932_v9 = vsub.s32 6, %v2611_v2  ;;  %618 = vmatprep.subr.bf16.mxu0 %v2136_v5  ;;  %v889_v21 = vsub.s32 5, %v2611_v2  ;;  %s2343_s21 = smov 1  }
  0x81   : > { %s543_s13 = scalar_lea.vmem %s3250_s0, %s2043_s25  ;;  %v2144_v22 = vld [vmem:[#allocation9] ss:$8 sps:$4 sm:$0xff]   ;;  %v827_v25 = vsub.s32 3, %v2611_v2  ;;  %vm604_vm0 = vcmask 523264   ;;  %v781_v29 = vsub.s32 2, %v2611_v2  ;;  %s2344_s24 = smov 127  }
  0x82   : > { %v976_v14 = vrot.slane %v545_v11, %v975_v8  ;;  %v2619_v15 = vrot.slane %v545_v11, %v873_v7  ;;  %v933_v16 = vrot.slane %v545_v11, %v932_v9  ;;  %v2621_v17 = vrot.slane %v546_v12, %v873_v7  ;;  %v2145_v26 = vld [vmem:[%s543_s13] sm:$0xff]   ;;  %s2345_s20 = smov 113   ;;  %s2346_s18 = smov 112   ;;  %v2027_v39 = vld [vmem:[#allocation10 + $0x18] ss:$0 sm:$0xff] }
  0x83   : > { %619 = vmatpush1.bf16.msra.mxu0 %v2138_v6  ;;  %v980_v19 = vrot.slane %v546_v12, %v975_v8  ;;  %v937_v20 = vrot.slane %v546_v12, %v932_v9  ;;  %v890_v23 = vrot.slane %v545_v11, %v889_v21  ;;  %v894_v24 = vrot.slane %v546_v12, %v889_v21  ;;  %s2347_s9 = smov 111   ;;  %v2026_v38 = vld [vmem:[#allocation10 + $0x10] ss:$0 sm:$0xff]  ;;  %s2348_s17 = smov 17   ;;  %v1189_v40 = vld [vmem:[%s2592_s30] sm:$0xf] }
  0x84   : > { %620 = vmatprep.subr.bf16.mxu0 %v2139_v10  ;;  %983 = vrot.lane.b32.xlu0 %v976_v14, %s2341_s19  ;;  %v828_v27 = vrot.slane %v545_v11, %v827_v25  ;;  %v832_v28 = vrot.slane %v546_v12, %v827_v25  ;;  %v782_v30 = vrot.slane %v545_v11, %v781_v29  ;;  %v735_v32 = vsub.s32 1, %v2611_v2  ;;  %s3310_s16 = sld [smem:[#allocation23_spill]]  ;;  %s2044_s30 = sshll.u32 %s2442_s29, 7 }
  0x85   : > { %940 = vrot.lane.b32.xlu1 %v933_v16, %s2342_s22  ;;  %v786_v31 = vrot.slane %v546_v12, %v781_v29  ;;  %v689_v35 = vsub.s32 0, %v2611_v2  ;;  %v1190_v41 = vunpack.c.l.bf16 %v1189_v40  ;;  %v2349_v43 = vmov 0.0   ;;  %s3311_s27 = sld [smem:[#allocation27_spill]] }
  0x86   : > { %v736_v33 = vrot.slane %v545_v11, %v735_v32  ;;  %v740_v34 = vrot.slane %v546_v12, %v735_v32  ;;  %651 = vst [vmem:[#allocation2] sm:$0xff] %v2349_v43  ;;  %653 = vst [vmem:[#allocation2 + $0x10] sm:$0xff] %v2349_v43  ;;  %vm767_vm1 = vcmask 130048   ;;  %vm813_vm2 = vcmask 121856  }
  0x87   : > { %621 = vmatpush1.bf16.msra.mxu0 %v2141_v13  ;;  %v690_v36 = vrot.slane %v545_v11, %v689_v35  ;;  %v694_v37 = vrot.slane %v546_v12, %v689_v35  ;;  %v1192_v42 = vcombine.high %v1190_v41, %v1190_v41  ;;  %1194 = vst [vmem:[#allocation3 + $0x18] sm:$0xf] %v1190_v41  ;;  %655 = vst [vmem:[#allocation2 + $0x20] sm:$0xff] %v2349_v43  ;;  %vm3279_vm3 = vcmask 7168  }
  0x88   : > { %622 = vmatprep.subr.bf16.mxu0 %v2142_v18  ;;  %985 = vrot.lane.b32.xlu0 %v980_v19, %s2341_s19  ;;  %657 = vst [vmem:[#allocation2 + $0x30] sm:$0xff] %v2349_v43  ;;  %659 = vst [vmem:[#allocation2 + $0x40] sm:$0xff] %v2349_v43  ;;  %vm839_vm4 = vcmask 1039360   ;;  %vm793_vm5 = vcmask 924672   ;;  %vm747_vm6 = vcmask 916480   ;;  %vm701_vm7 = vcmask 908288  }
  0x89   : > { %942 = vrot.lane.b32.xlu1 %v937_v20, %s2342_s22  ;;  %1195 = vst [vmem:[#allocation3 + $0x8] sm:$0xf] %v1192_v42  ;;  %661 = vst [vmem:[#allocation2 + $0x50] sm:$0xff] %v2349_v43  ;;  %vm721_vm8 = vcmask 138240   ;;  %vm866_vm9 = vcmask 1047560   ;;  %vm820_vm10 = vcmask 1047672  }
  0x8a   : > { %663 = vst [vmem:[#allocation2 + $0x60] sm:$0xff] %v2349_v43  ;;  %665 = vst [vmem:[#allocation2 + $0x70] sm:$0xff] %v2349_v43  ;;  %vm774_vm11 = vcmask 1047680   ;;  %vm728_vm12 = vcmask 1047688   ;;  %vm1475_vm13 = vcmask 904192   ;;  %vm1415_vm14 = vcmask 920576  }
  0x8b   : > { %623 = vmatpush1.bf16.msra.mxu0 %v2144_v22  ;;  %672 = vst [vmem:[#allocation2 + $0xa8] sm:$0xff] %v2349_v43  ;;  %674 = vst [vmem:[#allocation2 + $0xb8] sm:$0xff] %v2349_v43  ;;  %vm3276_vm15 = vcmask 1043576   ;;  %s3312_s13 = smov %s3311_s27  ;;  %s1871_s4 = scalar_lea.hbm %s3311_s27, %s2044_s30 }
  0x8c   : > { %897 = vrot.lane.b32.xlu0 %v890_v23, %s2343_s21  ;;  %676 = vst [vmem:[#allocation2 + $0xc8] sm:$0xff] %v2349_v43  ;;  %678 = vst [vmem:[#allocation2 + $0xd8] sm:$0xff] %v2349_v43  ;;  %p3313_p9 = scmp.ne.s32.totalorder %s3310_s16, 0 }
  0x8d   : > { %899 = vrot.lane.b32.xlu1 %v894_v24, %s2343_s21  ;;  %680 = vst [vmem:[#allocation2 + $0xe8] sm:$0xff] %v2349_v43  ;;  %682 = vst [vmem:[#allocation2 + $0xf8] sm:$0xff] %v2349_v43 }
  0x8e   : > { %2025 = vmatmul.mubr.msk.bf16.vlgmr.msra.gmra.mxu0 %vm604_vm0, %v2145_v26  ;;  %684 = vst [vmem:[#allocation2 + $0x108] sm:$0xff] %v2349_v43  ;;  %686 = vst [vmem:[#allocation2 + $0x118] sm:$0xff] %v2349_v43  ;;  %vm1263_vm0 = vcmask 1043456  }
  0x8f   : > { %1569 = vmatprep.mubr.bf16.mxu0 %v2340_v0  ;;  %1220 = vst [vmem:[#allocation2 + $0xa0] sm:$0xff] %v2349_v43  ;;  %1217 = vst [vmem:[#allocation2 + $0x88] sm:$0xff] %v2349_v43 }
  0x90   : > { %835 = vrot.lane.b32.xlu0 %v828_v27, %s2344_s24  ;;  %1219 = vst [vmem:[#allocation2 + $0x98] sm:$0xff] %v2349_v43  ;;  %1215 = vst [vmem:[#allocation2 + $0x78] sm:$0xff] %v2349_v43 }
  0x91   : > { %837 = vrot.lane.b32.xlu1 %v832_v28, %s2344_s24  ;;  %1209 = vst [vmem:[#allocation2 + $0x48] sm:$0xff] %v2349_v43  ;;  %1203 = vst [vmem:[#allocation2 + $0x18] sm:$0xff] %v2349_v43 }
  0x92   : > { %1589 = vst [vmem:[#allocation2 + $0x28] sm:$0xff] %v2349_v43  ;;  %1591 = vst [vmem:[#allocation2 + $0x38] sm:$0xff] %v2349_v43 }
  0x93   : > { %1585 = vst [vmem:[#allocation2 + $0x8] sm:$0xff] %v2349_v43 }
  0x94   : > { %789 = vrot.lane.b32.xlu0 %v782_v30, %s2345_s20 }
  0x95   : > { %791 = vrot.lane.b32.xlu1 %v786_v31, %s2345_s20 }
  0x98   : > { %743 = vrot.lane.b32.xlu0 %v736_v33, %s2346_s18 }
  0x99   : > { %745 = vrot.lane.b32.xlu1 %v740_v34, %s2346_s18 }
  0x9c   : > { %697 = vrot.lane.b32.xlu0 %v690_v36, %s2347_s9 }
  0x9d   : > { %699 = vrot.lane.b32.xlu1 %v694_v37, %s2347_s9 }
  0xa0   : > { %1026 = vrot.lane.b32.xlu0 %v2026_v38, %s2348_s17 }
  0xa1   : > { %1028 = vrot.lane.b32.xlu1 %v2027_v39, %s2348_s17 }
  0xf6   : > { %v2671_v44 = vpop.permute.xlu0 %983 }
  0xf7   : > { %v2673_v45 = vpop.permute.xlu1 %940 }
  0xfa   : > { %v986_v46 = vpop.permute.xlu0 %985 }
  0xfb   : > { %v943_v47 = vpop.permute.xlu1 %942  ;;  %v2683_v52 = vsel %vm767_vm1, %v2671_v44, %v986_v46 }
  0xfc   : > { %v2694_v57 = vsel %vm813_vm2, %v2673_v45, %v943_v47 }
  0xfe   : > { %v2675_v48 = vpop.permute.xlu0 %897 }
  0xff   : > { %v900_v49 = vpop.permute.xlu1 %899 }
 0x100   : > { %v2710_v62 = vsel %vm3279_vm3, %v2675_v48, %v900_v49 }
 0x102   : > { %v836_v54 = vpop.permute.xlu0 %835 }
 0x103   : > { %v2687_v55 = vpop.permute.xlu1 %837 }
 0x104   : > { %v2723_v4 = vsel %vm839_vm4, %v836_v54, %v2687_v55 }
 0x106   : > { %v790_v1 = vpop.permute.xlu0 %789 }
 0x107   : > { %v2716_v2 = vpop.permute.xlu1 %791 }
 0x108   : > { %v2735_v8 = vsel %vm793_vm5, %v790_v1, %v2716_v2 }
 0x10a   : > { %v744_v9 = vpop.permute.xlu0 %743 }
 0x10b   : > { %v2737_v10 = vpop.permute.xlu1 %745 }
 0x10c   : > { %v2747_v13 = vsel %vm747_vm6, %v744_v9, %v2737_v10 }
 0x10e   : > { %v698_v16 = vpop.permute.xlu0 %697 }
 0x10f   : > { %v2752_v18 = vpop.permute.xlu1 %699 }
 0x110   : > { %v2759_v20 = vsel %vm701_vm7, %v698_v16, %v2752_v18 }
 0x112   : > { %v2808_v37 = vpop.permute.xlu0 %1026 }
 0x113   : > { %v1029_v38 = vpop.permute.xlu1 %1028 }
 0x114   : > { %v2818_v41 = vsel %vm721_vm8, %v2808_v37, %v1029_v38 }
 0x14e   : > { %v2677_v50 = vpop.f32.mrf.mxu0 }
 0x14f   : > { %v990_v51 = vmul.f32 %v2671_v44, %v2677_v50  ;;  %v947_v59 = vmul.f32 %v2673_v45, %v2677_v50  ;;  %v2714_v63 = vmul.f32 %v2619_v15, %v2677_v50  ;;  %v904_v3 = vmul.f32 %v2675_v48, %v2677_v50 }
 0x150   : > { %v2685_v53 = vpop.f32.mrf.mxu0  ;;  %v843_v7 = vmul.f32 %v2723_v4, %v2677_v50  ;;  %v797_v12 = vmul.f32 %v2735_v8, %v2677_v50  ;;  %v751_v19 = vmul.f32 %v2747_v13, %v2677_v50  ;;  %v705_v22 = vmul.f32 %v2759_v20, %v2677_v50 }
 0x151   : > { %998 = vrot.lane.b32.xlu0 %v990_v51, %s2346_s18  ;;  %v991_v56 = vmul.f32 %v2683_v52, %v2685_v53  ;;  %v948_v61 = vmul.f32 %v2694_v57, %v2685_v53  ;;  %v905_v6 = vmul.f32 %v2710_v62, %v2685_v53  ;;  %v844_v11 = vmul.f32 %v2687_v55, %v2685_v53  ;;  %v2835_v51 = vld.sshfl [vmem:[%s3255_s5] sm:$0x33 pattern:$0x76325410] }
 0x152   : > { %v2696_v58 = vpop.f32.mrf.mxu0  ;;  %v798_v14 = vmul.f32 %v2716_v2, %v2685_v53  ;;  %v752_v21 = vmul.f32 %v2737_v10, %v2685_v53  ;;  %v706_v23 = vmul.f32 %v2752_v18, %v2685_v53  ;;  %v1033_v42 = vmul.f32 %v2808_v37, %v2677_v50  ;;  %v1114_v50 = vld [vmem:[%s3256_s6] sm:$0xf] }
 0x153   : > { %1000 = vrot.lane.b32.xlu1 %v991_v56, %s2346_s18  ;;  %v2703_v60 = vmul.f32 %v2619_v15, %v2696_v58  ;;  %v992_v25 = vmul.f32 %v2671_v44, %v2696_v58  ;;  %v949_v27 = vmul.f32 %v2673_v45, %v2696_v58  ;;  %v906_v29 = vmul.f32 %v2675_v48, %v2696_v58  ;;  %v2843_v56 = vld [vmem:[#allocation3 + $0x8] sm:$0xf] }
 0x154   : > { %v2770_v24 = vpop.f32.mrf.mxu0  ;;  %v845_v31 = vmul.f32 %v2723_v4, %v2696_v58  ;;  %v799_v33 = vmul.f32 %v2735_v8, %v2696_v58  ;;  %v753_v35 = vmul.f32 %v2747_v13, %v2696_v58  ;;  %v707_v39 = vmul.f32 %v2759_v20, %v2696_v58 }
 0x155   : > { %955 = vrot.lane.b32.xlu0 %v947_v59, %s2345_s20  ;;  %v1103_v5 = vpack.c.bf16 %v2703_v60, %v2714_v63  ;;  %v993_v26 = vmul.f32 %v2683_v52, %v2770_v24  ;;  %v950_v28 = vmul.f32 %v2694_v57, %v2770_v24  ;;  %v907_v30 = vmul.f32 %v2710_v62, %v2770_v24  ;;  %v2848_v59 = vld [vmem:[#allocation3 + $0x18] sm:$0xf] }
 0x156   : > { %v846_v32 = vmul.f32 %v2687_v55, %v2770_v24  ;;  %v800_v34 = vmul.f32 %v2716_v2, %v2770_v24  ;;  %v754_v36 = vmul.f32 %v2737_v10, %v2770_v24  ;;  %v708_v40 = vmul.f32 %v2752_v18, %v2770_v24 }
 0x157   : > { %957 = vrot.lane.b32.xlu1 %v948_v61, %s2345_s20  ;;  %v1034_v46 = vmul.f32 %v2818_v41, %v2685_v53  ;;  %v1035_v47 = vmul.f32 %v2808_v37, %v2696_v58  ;;  %v1036_v49 = vmul.f32 %v2818_v41, %v2770_v24  ;;  %v1128_v54 = vcombine.high %v2835_v51, %v2835_v51 }
 0x158   : > { %v1453_v58 = vmul.f32 %v2843_v56, %v2818_v41  ;;  %v1452_v61 = vmul.f32 %v2848_v59, %v2808_v37  ;;  %v1393_v1 = vmul.f32 %v2843_v56, %v2694_v57 }
 0x159   : > { %912 = vrot.lane.b32.xlu0 %v904_v3, %s2344_s24  ;;  %2029 = vmatprep.mubr.msk.bf16.mxu1 %vm767_vm1, %v1128_v54  ;;  %v1392_v3 = vmul.f32 %v2848_v59, %v2673_v45 }
 0x15b   : > { %914 = vrot.lane.b32.xlu1 %v905_v6, %s2344_s24  ;;  %v1292_v6 = vmul.f32 %v2843_v56, %v2716_v2 }
 0x15d   : > { %851 = vrot.lane.b32.xlu0 %v843_v7, %s2343_s21  ;;  %v1291_v7 = vmul.f32 %v2848_v59, %v2735_v8 }
 0x15f   : > { %853 = vrot.lane.b32.xlu1 %v844_v11, %s2343_s21 }
 0x161   : > { %805 = vrot.lane.b32.xlu0 %v797_v12, %s2342_s22 }
 0x163   : > { %807 = vrot.lane.b32.xlu1 %v798_v14, %s2342_s22 }
 0x165   : > { %759 = vrot.lane.b32.xlu0 %v751_v19, %s2341_s19 }
 0x167   : > { %761 = vrot.lane.b32.xlu1 %v752_v21, %s2341_s19 }
 0x169   : > { %713 = vrot.lane.b32.xlu0 %v705_v22, %s2348_s17 }
 0x16b   : > { %715 = vrot.lane.b32.xlu1 %v706_v23, %s2348_s17 }
 0x16d   : > { %1002 = vrot.lane.b32.xlu0 %v992_v25, %s2346_s18 }
 0x16f   : > { %1004 = vrot.lane.b32.xlu1 %v993_v26, %s2346_s18 }
 0x171   : > { %959 = vrot.lane.b32.xlu0 %v949_v27, %s2345_s20 }
 0x173   : > { %961 = vrot.lane.b32.xlu1 %v950_v28, %s2345_s20 }
 0x175   : > { %916 = vrot.lane.b32.xlu0 %v906_v29, %s2344_s24 }
 0x177   : > { %918 = vrot.lane.b32.xlu1 %v907_v30, %s2344_s24 }
 0x179   : > { %855 = vrot.lane.b32.xlu0 %v845_v31, %s2343_s21 }
 0x17b   : > { %857 = vrot.lane.b32.xlu1 %v846_v32, %s2343_s21 }
 0x17d   : > { %809 = vrot.lane.b32.xlu0 %v799_v33, %s2342_s22 }
 0x17f   : > { %811 = vrot.lane.b32.xlu1 %v800_v34, %s2342_s22 }
 0x181   : > { %763 = vrot.lane.b32.xlu0 %v753_v35, %s2341_s19 }
 0x183   : > { %765 = vrot.lane.b32.xlu1 %v754_v36, %s2341_s19 }
 0x185   : > { %717 = vrot.lane.b32.xlu0 %v707_v39, %s2348_s17 }
 0x187   : > { %719 = vrot.lane.b32.xlu1 %v708_v40, %s2348_s17 }
 0x189   : > { %1041 = vrot.lane.b32.xlu0 %v1033_v42, %s2347_s9 }
 0x18b   : > { %1043 = vrot.lane.b32.xlu1 %v1034_v46, %s2347_s9 }
 0x18d   : > { %1045 = vrot.lane.b32.xlu0 %v1035_v47, %s2347_s9 }
 0x18f   : > { %1047 = vrot.lane.b32.xlu1 %v1036_v49, %s2347_s9 }
 0x191   : > { %1117 = vperm.xlu0 %2131, %v1114_v50  }
 0x193   : > { %1464 = vrot.lane.b32.xlu1 %v1453_v58, %s2347_s9 }
 0x195   : > { %1462 = vrot.lane.b32.xlu0 %v1452_v61, %s2347_s9 }
 0x197   : > { %1404 = vrot.lane.b32.xlu1 %v1393_v1, %s2345_s20 }
 0x199   : > { %1402 = vrot.lane.b32.xlu0 %v1392_v3, %s2345_s20 }
 0x19b   : > { %1303 = vrot.lane.b32.xlu1 %v1292_v6, %s2342_s22 }
 0x19d   : > { %1301 = vrot.lane.b32.xlu0 %v1291_v7, %s2342_s22 }
 0x1c3   : > { %v999_v9 = vpop.permute.xlu0 %998 }
 0x1c5   : > { %v1001_v11 = vpop.permute.xlu1 %1000 }
 0x1c6   : > { %v1006_v12 = vsel %vm747_vm6, %v999_v9, %v1001_v11  ;;  %1013 = vst.msk [vmem:[#allocation2 + $0xe8] sm:$0xff] %vm747_vm6, %v1001_v11 }
 0x1c7   : > { %v956_v14 = vpop.permute.xlu0 %955 }
 0x1c9   : > { %v958_v16 = vpop.permute.xlu1 %957 }
 0x1ca   : > { %970 = vst.msk [vmem:[#allocation2 + $0xc8] sm:$0xff] %vm793_vm5, %v958_v16  ;;  %v963_v7 = vsel %vm793_vm5, %v956_v14, %v958_v16 }
 0x1cb   : > { %v2869_v19 = vpop.permute.xlu0 %912 }
 0x1cd   : > { %v2871_v21 = vpop.permute.xlu1 %914  ;;  %v1088_v50 = vld [vmem:[#allocation2 + $0xe8] sm:$0xff] }
 0x1ce   : > { %927 = vst.msk [vmem:[#allocation2 + $0xa8] sm:$0xff] %vm839_vm4, %v2871_v21  ;;  %v920_v14 = vsel %vm839_vm4, %v2869_v19, %v2871_v21 }
 0x1cf   : > { %v2875_v22 = vpop.permute.xlu0 %851 }
 0x1d0   : > { %867 = vst.msk [vmem:[#allocation2 + $0x60] sm:$0xff] %vm866_vm9, %v2875_v22 }
 0x1d1   : > { %v2879_v23 = vpop.permute.xlu1 %853  ;;  %v1084_v25 = vld [vmem:[#allocation2 + $0xc8] sm:$0xff] }
 0x1d2   : > { %1225 = vst [vmem:[#allocation2 + $0xc8] sm:$0xff] %v2349_v43 }
 0x1d3   : > { %v2882_v26 = vpop.permute.xlu0 %805 }
 0x1d4   : > { %821 = vst.msk [vmem:[#allocation2 + $0x40] sm:$0xff] %vm820_vm10, %v2882_v26 }
 0x1d5   : > { %v2886_v27 = vpop.permute.xlu1 %807  ;;  %v1080_v28 = vld [vmem:[#allocation2 + $0xa8] sm:$0xff] }
 0x1d6   : > { %1221 = vst [vmem:[#allocation2 + $0xa8] sm:$0xff] %v2349_v43 }
 0x1d7   : > { %v2889_v29 = vpop.permute.xlu0 %759 }
 0x1d8   : > { %775 = vst.msk [vmem:[#allocation2 + $0x20] sm:$0xff] %vm774_vm11, %v2889_v29 }
 0x1d9   : > { %v2893_v30 = vpop.permute.xlu1 %761 }
 0x1da   : > { %v768_v60 = vsel %vm767_vm1, %v2889_v29, %v2893_v30 }
 0x1db   : > { %v2895_v31 = vpop.permute.xlu0 %713  ;;  %v2897_v32 = vld [vmem:[#allocation2 + $0x40] sm:$0xff] }
 0x1dc   : > { %729 = vst.msk [vmem:[#allocation2] sm:$0xff] %vm728_vm12, %v2895_v31  ;;  %1208 = vst [vmem:[#allocation2 + $0x40] sm:$0xff] %v2349_v43 }
 0x1dd   : > { %v2902_v33 = vpop.permute.xlu1 %715 }
 0x1de   : > { %v722_v29 = vsel %vm721_vm8, %v2895_v31, %v2902_v33 }
 0x1df   : > { %v1003_v34 = vpop.permute.xlu0 %1002  ;;  %v2904_v35 = vld [vmem:[#allocation2 + $0x20] sm:$0xff] }
 0x1e0   : > { %1204 = vst [vmem:[#allocation2 + $0x20] sm:$0xff] %v2349_v43 }
 0x1e1   : > { %v1005_v36 = vpop.permute.xlu1 %1004 }
 0x1e2   : > { %v1007_v38 = vsel %vm747_vm6, %v1003_v34, %v1005_v36  ;;  %1015 = vst.msk [vmem:[#allocation2 + $0xf8] sm:$0xff] %vm747_vm6, %v1005_v36  ;;  %v882_v36 = vmul.f32 %v2621_v17, %v2770_v24 }
 0x1e3   : > { %v960_v39 = vpop.permute.xlu0 %959  ;;  %v2909_v40 = vld [vmem:[#allocation2] sm:$0xff]  ;;  %v1109_v1 = vpack.c.bf16 %v1007_v38, %v1006_v12 }
 0x1e4   : > { %1200 = vst [vmem:[#allocation2] sm:$0xff] %v2349_v43 }
 0x1e5   : > { %v962_v42 = vpop.permute.xlu1 %961 }
 0x1e6   : > { %v964_v46 = vsel %vm793_vm5, %v960_v39, %v962_v42  ;;  %972 = vst.msk [vmem:[#allocation2 + $0xd8] sm:$0xff] %vm793_vm5, %v962_v42  ;;  %v880_v42 = vmul.f32 %v2621_v17, %v2685_v53  ;;  %v860_v53 = vsel %vm3279_vm3, %v2875_v22, %v2879_v23  ;;  %v814_v22 = vsel %vm813_vm2, %v2882_v26, %v2886_v27 }
 0x1e7   : > { %971 = vst [vmem:[#allocation2 + $0xd0] sm:$0xff] %v964_v46  ;;  %v917_v47 = vpop.permute.xlu0 %916  ;;  %v1107_v34 = vpack.c.bf16 %v964_v46, %v963_v7 }
 0x1e8   : > { %1226 = vst [vmem:[#allocation2 + $0xd0] sm:$0xf] %v2349_v43 }
 0x1e9   : > { %v919_v49 = vpop.permute.xlu1 %918  ;;  %v1090_v54 = vld [vmem:[#allocation2 + $0xf8] sm:$0xff] }
 0x1ea   : > { %929 = vst.msk [vmem:[#allocation2 + $0xb8] sm:$0xff] %vm839_vm4, %v919_v49  ;;  %v1110_v58 = vpack.c.bf16 %v1090_v54, %v1088_v50  ;;  %v921_v39 = vsel %vm839_vm4, %v917_v47, %v919_v49  ;;  %v1104_v47 = vpack.c.bf16 %v882_v36, %v880_v42 }
 0x1eb   : > { %v856_v61 = vpop.permute.xlu0 %855  ;;  %v1105_v24 = vpack.c.bf16 %v921_v39, %v920_v14 }
 0x1ec   : > { %869 = vst.msk [vmem:[#allocation2 + $0x70] sm:$0xff] %vm866_vm9, %v856_v61  ;;  %1133 = vmatprep.subr.bf16.mxu1 %v1110_v58 }
 0x1ed   : > { %v858_v3 = vpop.permute.xlu1 %857  ;;  %1134 = vmatpush1.bf16.msra.mxu1 %v1109_v1  ;;  %v1086_v6 = vld [vmem:[#allocation2 + $0xd8] sm:$0xff] }
 0x1ee   : > { %v1108_v9 = vpack.c.bf16 %v1086_v6, %v1084_v25  ;;  %1227 = vst [vmem:[#allocation2 + $0xd8] sm:$0xf] %v2349_v43  ;;  %v861_v49 = vsel %vm3279_vm3, %v856_v61, %v858_v3  ;;  %v1071_v61 = vld [vmem:[#allocation2 + $0x60] sm:$0xff] }
 0x1ef   : > { %v810_v11 = vpop.permute.xlu0 %809 }
 0x1f0   : > { %823 = vst.msk [vmem:[#allocation2 + $0x50] sm:$0xff] %vm820_vm10, %v810_v11  ;;  %1135 = vmatprep.subr.bf16.mxu1 %v1108_v9 }
 0x1f1   : > { %v812_v12 = vpop.permute.xlu1 %811  ;;  %1136 = vmatpush1.bf16.msra.mxu1 %v1107_v34  ;;  %v1082_v38 = vld [vmem:[#allocation2 + $0xb8] sm:$0xff] }
 0x1f2   : > { %v1106_v16 = vpack.c.bf16 %v1082_v38, %v1080_v28  ;;  %1223 = vst [vmem:[#allocation2 + $0xb8] sm:$0xff] %v2349_v43  ;;  %v1102_v28 = vpack.c.bf16 %v861_v49, %v860_v53  ;;  %v815_v54 = vsel %vm813_vm2, %v810_v11, %v812_v12  ;;  %v1174_v53 = vld [vmem:[%s2585_s3] sm:$0xf] }
 0x1f3   : > { %v764_v25 = vpop.permute.xlu0 %763  ;;  %v1073_v46 = vld [vmem:[#allocation2 + $0x70] sm:$0xff]  ;;  %v1100_v6 = vpack.c.bf16 %v815_v54, %v814_v22 }
 0x1f4   : > { %777 = vst.msk [vmem:[#allocation2 + $0x30] sm:$0xff] %vm774_vm11, %v764_v25  ;;  %1137 = vmatprep.subr.bf16.mxu1 %v1106_v16  ;;  %1214 = vst [vmem:[#allocation2 + $0x70] sm:$0xff] %v2349_v43  ;;  %v1101_v1 = vpack.c.bf16 %v1073_v46, %v1071_v61 }
 0x1f5   : > { %v766_v50 = vpop.permute.xlu1 %765  ;;  %1138 = vmatpush1.bf16.msra.mxu1 %v1105_v24 }
 0x1f6   : > { %1139 = vmatprep.subr.bf16.mxu1 %v1104_v47  ;;  %v769_v7 = vsel %vm767_vm1, %v764_v25, %v766_v50 }
 0x1f7   : > { %v718_v19 = vpop.permute.xlu0 %717  ;;  %v1069_v21 = vld [vmem:[#allocation2 + $0x50] sm:$0xff]  ;;  %v1098_v26 = vpack.c.bf16 %v769_v7, %v768_v60 }
 0x1f8   : > { %731 = vst.msk [vmem:[#allocation2 + $0x10] sm:$0xff] %vm728_vm12, %v718_v19  ;;  %1210 = vst [vmem:[#allocation2 + $0x50] sm:$0xff] %v2349_v43  ;;  %v1099_v63 = vpack.c.bf16 %v1069_v21, %v2897_v32 }
 0x1f9   : > { %v720_v58 = vpop.permute.xlu1 %719  ;;  %1140 = vmatpush1.bf16.msra.mxu1 %v1103_v5 }
 0x1fa   : > { %1141 = vmatprep.subr.bf16.mxu1 %v1102_v28  ;;  %v723_v27 = vsel %vm721_vm8, %v718_v19, %v720_v58 }
 0x1fb   : > { %v1042_v23 = vpop.permute.xlu0 %1041  ;;  %v1065_v3 = vld [vmem:[#allocation2 + $0x30] sm:$0xff]  ;;  %v1096_v32 = vpack.c.bf16 %v723_v27, %v722_v29 }
 0x1fc   : > { %1206 = vst [vmem:[#allocation2 + $0x30] sm:$0xff] %v2349_v43  ;;  %v1097_v30 = vpack.c.bf16 %v1065_v3, %v2904_v35 }
 0x1fd   : > { %v1044_v9 = vpop.permute.xlu1 %1043  ;;  %1142 = vmatpush1.bf16.msra.mxu1 %v1101_v1 }
 0x1fe   : > { %v1049_v11 = vsel %vm701_vm7, %v1042_v23, %v1044_v9  ;;  %1056 = vst.msk [vmem:[#allocation2 + $0x108] sm:$0xff] %vm701_vm7, %v1044_v9  ;;  %1143 = vmatprep.subr.bf16.mxu1 %v1100_v6 }
 0x1ff   : > { %v1061_v5 = vld [vmem:[#allocation2 + $0x10] sm:$0xff]  ;;  %v1046_v34 = vpop.permute.xlu0 %1045 }
 0x200   : > { %1202 = vst [vmem:[#allocation2 + $0x10] sm:$0xff] %v2349_v43  ;;  %v1095_v38 = vpack.c.bf16 %v1061_v5, %v2909_v40 }
 0x201   : > { %v1048_v36 = vpop.permute.xlu1 %1047  ;;  %1144 = vmatpush1.bf16.msra.mxu1 %v1099_v63 }
 0x202   : > { %v1050_v39 = vsel %vm701_vm7, %v1046_v34, %v1048_v36  ;;  %1058 = vst.msk [vmem:[#allocation2 + $0x118] sm:$0xff] %vm701_vm7, %v1048_v36  ;;  %1145 = vmatprep.subr.bf16.mxu1 %v1098_v26  ;;  %v1351_v36 = vmul.f32 %v2848_v59, %v2619_v15 }
 0x203   : > { %v1111_v31 = vpack.c.bf16 %v1050_v39, %v1049_v11  ;;  %v1352_v39 = vmul.f32 %v2843_v56, %v2621_v17 }
 0x204   : > { %1355 = vst [vmem:[#allocation2 + $0x70] sm:$0xf] %v1351_v36 }
 0x205   : > { %v1465_v12 = vpop.permute.xlu1 %1464  ;;  %1146 = vmatpush1.bf16.msra.mxu1 %v1097_v30  ;;  %v1092_v14 = vld [vmem:[#allocation2 + $0x108] sm:$0xff]  ;;  %1356 = vst [vmem:[#allocation2 + $0x78] sm:$0xf] %v1352_v39 }
 0x206   : > { %1476 = vst.msk [vmem:[#allocation2 + $0xd8] sm:$0xf] %vm1475_vm13, %v1465_v12  ;;  %1147 = vmatprep.subr.bf16.mxu1 %v1096_v32 }
 0x209   : > { %v1405_v42 = vpop.permute.xlu1 %1404  ;;  %1148 = vmatpush1.bf16.msra.mxu1 %v1095_v38  ;;  %v1094_v16 = vld [vmem:[#allocation2 + $0x118] sm:$0xff] }
 0x20a   : > { %1416 = vst.msk [vmem:[#allocation2 + $0xa8] sm:$0xf] %vm1415_vm14, %v1405_v42  ;;  %v1112_v25 = vpack.c.bf16 %v1094_v16, %v1092_v14  ;;  %v1419_v16 = vmul.f32 %v2848_v59, %v2671_v44 }
 0x20c   : > { %1163 = vmatprep.subr.bf16.mxu1 %v1112_v25  ;;  %v1118_v33 = vpop.permute.xlu0 %1117 }
 0x20d   : > { %1164 = vmatpush2.bf16.msra.mxu1 %v1111_v31  ;;  %v1304_v47 = vpop.permute.xlu1 %1303 }
 0x210   : > { %1166 = vmatmul.mubr.bf16.vlgmr.msra.gmra.mxu1 %v2835_v51  ;;  %v1463_v35 = vpop.permute.xlu0 %1462  ;;  %v1175_v51 = vunpack.c.l.bf16 %v1174_v53 }
 0x211   : > { %v1467_v24 = vsel %vm701_vm7, %v1463_v35, %v1465_v12  ;;  %1776 = vmatprep.mubr.bf16.mxu1 %v2340_v0  ;;  %v1427_v35 = vrot.slane %v1419_v16, 4 }
 0x212   : > { %1474 = vst [vmem:[#allocation2 + $0xd0] sm:$0xf] %v1467_v24  ;;  %1179 = vst [vmem:[#allocation3 + $0x10] sm:$0xf] %v1175_v51  ;;  %v1177_v19 = vcombine.high %v1175_v51, %v1175_v51  ;;  %v1359_v24 = vmul.f32 %v2848_v59, %v2675_v48 }
 0x214   : > { %v1403_v40 = vpop.permute.xlu0 %1402  ;;  %1180 = vst [vmem:[#allocation3] sm:$0xf] %v1177_v19 }
 0x215   : > { %v1407_v46 = vsel %vm793_vm5, %v1403_v40, %v1405_v42 }
 0x216   : > { %1414 = vst [vmem:[#allocation2 + $0xa0] sm:$0xf] %v1407_v46 }
 0x218   : > { %v1302_v49 = vpop.permute.xlu0 %1301 }
 0x219   : > { %v1306_v50 = vsel %vm813_vm2, %v1302_v49, %v1304_v47  ;;  %1314 = vst.msk [vmem:[#allocation2 + $0x40] sm:$0xf] %vm3276_vm15, %v1302_v49  ;;  %v1367_v49 = vrot.slane %v1359_v24, 4  ;;  %vm1386_vm15 = vcmask 1039364  }
 0x21a   : > { %1315 = vst [vmem:[#allocation2 + $0x48] sm:$0xf] %v1306_v50  ;;  %v1420_v50 = vmul.f32 %v2843_v56, %v2683_v52 }
 0x21c   : > { %v1429_v19 = vrot.slane %v1420_v50, 4 }
 0x2d0   : > { %v1167_v21 = vpop.f32.mrf.mxu1 }
 0x2d1   : > { %v1168_v28 = vadd.f32 %v1167_v21, %v1118_v33  ;;  %v1360_v21 = vmul.f32 %v2843_v56, %v2710_v62 }
 0x2d2   : > { %v1169_v54 = vpop.f32.mrf.mxu1 }
 0x2d3   : > { %v1183_v58 = vrot.slane %v1168_v28, 4  ;;  %v1170_v61 = vadd.f32 %v1169_v54, %v1118_v33  ;;  %v1318_v28 = vmul.f32 %v2848_v59, %v2723_v4  ;;  %v1230_v54 = vmul.f32 %v2848_v59, %v2759_v20 }
 0x2d4   : > { %v1171_v22 = vpop.f32.mrf.mxu1 }
 0x2d5   : > { %1187 = vst [vmem:[#allocation3 + $0x10] sm:$0xf0] %v1183_v58  ;;  %v1184_v23 = vrot.slane %v1170_v61, 4  ;;  %v1369_v22 = vrot.slane %v1360_v21, 4 }
 0x2d6   : > { %v1172_v1 = vpop.f32.mrf.mxu1 }
 0x2d7   : > { %1188 = vst [vmem:[#allocation3] sm:$0xf0] %v1184_v23  ;;  %v1326_v23 = vrot.slane %v1318_v28, 4  ;;  %v1257_v1 = vmul.f32 %v2848_v59, %v2747_v13 }
 0x2dc   : > { %v2970_v3 = vld [vmem:[#allocation3 + $0x10] sm:$0xff] }
 0x2dd   : > { %v1450_v6 = vmul.f32 %v2970_v3, %v2808_v37  ;;  %v1390_v7 = vmul.f32 %v2970_v3, %v2673_v45  ;;  %v1289_v60 = vmul.f32 %v2970_v3, %v2735_v8  ;;  %v1228_v26 = vmul.f32 %v2970_v3, %v2759_v20 }
 0x2de   : > { %v2976_v9 = vld [vmem:[#allocation3] sm:$0xff]  ;;  %v1417_v27 = vmul.f32 %v2970_v3, %v2671_v44  ;;  %v2998_v34 = vmul.f32 %v2970_v3, %v2619_v15  ;;  %v1357_v32 = vmul.f32 %v2970_v3, %v2675_v48  ;;  %v1316_v14 = vmul.f32 %v2970_v3, %v2723_v4 }
 0x2df   : > { %1458 = vrot.lane.b32.xlu1 %v1450_v6, %s2347_s9  ;;  %1398 = vrot.lane.b32.xlu0 %v1390_v7, %s2345_s20  ;;  %v1451_v11 = vmul.f32 %v2976_v9, %v2818_v41  ;;  %v2988_v63 = vmul.f32 %v2976_v9, %v2621_v17  ;;  %v1391_v5 = vmul.f32 %v2976_v9, %v2694_v57 }
 0x2e0   : > { %1353 = vst [vmem:[#allocation2 + $0x60] sm:$0xff] %v2998_v34  ;;  %v1290_v29 = vmul.f32 %v2976_v9, %v2716_v2  ;;  %v1425_v30 = vrot.slane %v1417_v27, 4  ;;  %v1229_v12 = vmul.f32 %v2976_v9, %v2752_v18  ;;  %v1365_v38 = vrot.slane %v1357_v32, 4 }
 0x2e1   : > { %v1418_v42 = vmul.f32 %v2976_v9, %v2683_v52  ;;  %v1324_v31 = vrot.slane %v1316_v14, 4  ;;  %v1358_v33 = vmul.f32 %v2976_v9, %v2710_v62  ;;  %v1317_v46 = vmul.f32 %v2976_v9, %v2687_v55 }
 0x2e2   : > { %v1428_v47 = vsel %vm1263_vm0, %v1425_v30, %v1427_v35  ;;  %v1368_v51 = vsel %vm1263_vm0, %v1365_v38, %v1367_v49  ;;  %v1255_v61 = vmul.f32 %v2970_v3, %v2747_v13  ;;  %v1256_v36 = vmul.f32 %v2976_v9, %v2737_v10 }
 0x2e3   : > { %1460 = vrot.lane.b32.xlu1 %v1451_v11, %s2347_s9  ;;  %1297 = vrot.lane.b32.xlu0 %v1289_v60, %s2342_s22  ;;  %v1426_v25 = vrot.slane %v1418_v42, 4  ;;  %v1366_v40 = vrot.slane %v1358_v33, 4  ;;  %v1325_v53 = vrot.slane %v1317_v46, 4  ;;  %v1327_v7 = vsel %vm1263_vm0, %v1324_v31, %v1326_v23  ;;  %v1503_v46 = vld [vmem:[#allocation2 + $0xd0] sm:$0xf] }
 0x2e4   : > { %v1264_v11 = vrot.slane %v1255_v61, 4  ;;  %v1266_v60 = vrot.slane %v1257_v1, 4  ;;  %v1265_v32 = vrot.slane %v1256_v36, 4 }
 0x2e5   : > { %v1430_v58 = vsel %vm1263_vm0, %v1426_v25, %v1429_v19  ;;  %v1370_v6 = vsel %vm1263_vm0, %v1366_v40, %v1369_v22 }
 0x2e6   : > { %v1267_v27 = vsel %vm1263_vm0, %v1264_v11, %v1266_v60 }
 0x2e7   : > { %1400 = vrot.lane.b32.xlu1 %v1391_v5, %s2345_s20  ;;  %1236 = vrot.lane.b32.xlu0 %v1228_v26, %s2348_s17  ;;  %v1319_v5 = vmul.f32 %v2843_v56, %v2687_v55  ;;  %v1231_v26 = vmul.f32 %v2843_v56, %v2752_v18 }
 0x2e9   : > { %v1328_v39 = vrot.slane %v1319_v5, 4 }
 0x2eb   : > { %1299 = vrot.lane.b32.xlu1 %v1290_v29, %s2342_s22  ;;  %1431 = vrot.lane.b32.xlu0 %v1425_v30, %s2346_s18  ;;  %v1258_v29 = vmul.f32 %v2843_v56, %v2737_v10  ;;  %v1329_v30 = vsel %vm1263_vm0, %v1325_v53, %v1328_v39 }
 0x2ef   : > { %1238 = vrot.lane.b32.xlu1 %v1229_v12, %s2348_s17  ;;  %1371 = vrot.lane.b32.xlu0 %v1365_v38, %s2344_s24  ;;  %v1268_v12 = vrot.slane %v1258_v29, 4  ;;  %v1520_v38 = vld [vmem:[%s3258_s8] sm:$0xf] }
 0x2f1   : > { %v1269_v42 = vsel %vm1263_vm0, %v1265_v32, %v1268_v12  ;;  %vm3278_vm0 = vcmask 1047564  }
 0x2f3   : > { %1433 = vrot.lane.b32.xlu1 %v1426_v25, %s2346_s18  ;;  %1330 = vrot.lane.b32.xlu0 %v1324_v31, %s2343_s21 }
 0x2f7   : > { %1373 = vrot.lane.b32.xlu1 %v1366_v40, %s2344_s24  ;;  %1435 = vrot.lane.b32.xlu0 %v1428_v47, %s2346_s18 }
 0x2fb   : > { %1332 = vrot.lane.b32.xlu1 %v1325_v53, %s2343_s21  ;;  %1375 = vrot.lane.b32.xlu0 %v1368_v51, %s2344_s24  ;;  %v1504_v51 = vld [vmem:[#allocation2 + $0xd8] sm:$0xf] }
 0x2ff   : > { %1437 = vrot.lane.b32.xlu1 %v1430_v58, %s2346_s18  ;;  %1240 = vrot.lane.b32.xlu0 %v1230_v54, %s2348_s17 }
 0x303   : > { %1377 = vrot.lane.b32.xlu1 %v1370_v6, %s2344_s24  ;;  %1334 = vrot.lane.b32.xlu0 %v1327_v7, %s2343_s21 }
 0x307   : > { %1242 = vrot.lane.b32.xlu1 %v1231_v26, %s2348_s17  ;;  %1274 = vrot.lane.b32.xlu0 %v1267_v27, %s2341_s19 }
 0x30b   : > { %1336 = vrot.lane.b32.xlu1 %v1329_v30, %s2343_s21  ;;  %1270 = vrot.lane.b32.xlu0 %v1264_v11, %s2341_s19 }
 0x30f   : > { %1276 = vrot.lane.b32.xlu1 %v1269_v42, %s2341_s19  ;;  %1523 = vperm.xlu0 %2131, %v1520_v38  }
 0x313   : > { %1272 = vrot.lane.b32.xlu1 %v1265_v32, %s2341_s19 }
 0x351   : > { %v1459_v14 = vpop.permute.xlu1 %1458  ;;  %v1399_v16 = vpop.permute.xlu0 %1398 }
 0x355   : > { %v1461_v25 = vpop.permute.xlu1 %1460  ;;  %v3076_v31 = vpop.permute.xlu0 %1297 }
 0x356   : > { %v1466_v33 = vsel %vm701_vm7, %v1459_v14, %v1461_v25  ;;  %1473 = vst.msk [vmem:[#allocation2 + $0xc8] sm:$0xff] %vm701_vm7, %v1461_v25 }
 0x357   : > { %1311 = vst.msk [vmem:[#allocation2 + $0x30] sm:$0xff] %vm820_vm10, %v3076_v31  ;;  %v1517_v47 = vpack.c.bf16 %v1503_v46, %v1466_v33  ;;  %vm1530_vm10 = vcmask 1045504  }
 0x359   : > { %v1401_v35 = vpop.permute.xlu1 %1400  ;;  %v3082_v24 = vpop.permute.xlu0 %1236  ;;  %v1532_v28 = vsel %vm1530_vm10, %v1517_v47, 0 }
 0x35a   : > { %v3085_v40 = vsel %vm793_vm5, %v1399_v16, %v1401_v35  ;;  %1413 = vst.msk [vmem:[#allocation2 + $0x98] sm:$0xff] %vm793_vm5, %v1401_v35 }
 0x35b   : > { %1250 = vst.msk [vmem:[#allocation2] sm:$0xff] %vm728_vm12, %v3082_v24  ;;  %vm3277_vm12 = vcmask 916484  }
 0x35d   : > { %v3090_v49 = vpop.permute.xlu1 %1299  ;;  %v1432_v50 = vpop.permute.xlu0 %1431  ;;  %v1502_v53 = vld [vmem:[#allocation2 + $0xc8] sm:$0xff] }
 0x35e   : > { %v3092_v19 = vld [vmem:[#allocation2 + $0x30] sm:$0xff]  ;;  %v1518_v21 = vpack.c.bf16 %v1504_v51, %v1502_v53 }
 0x35f   : > { %1590 = vst [vmem:[#allocation2 + $0x30] sm:$0xff] %v2349_v43 }
 0x360   : > { %2030 = vmatprep.subr.msk.bf16.mxu0 %vm1530_vm10, %v1518_v21 }
 0x361   : > { %v3097_v54 = vpop.permute.xlu1 %1238  ;;  %v1372_v58 = vpop.permute.xlu0 %1371  ;;  %1540 = vmatpush1.bf16.msra.mxu0 %v1532_v28  ;;  %v1496_v21 = vld [vmem:[#allocation2 + $0x98] sm:$0xff] }
 0x362   : > { %v3099_v61 = vld [vmem:[#allocation2] sm:$0xff] }
 0x363   : > { %1584 = vst [vmem:[#allocation2] sm:$0xff] %v2349_v43 }
 0x365   : > { %v1434_v22 = vpop.permute.xlu1 %1433  ;;  %v1331_v23 = vpop.permute.xlu0 %1330 }
 0x366   : > { %v1439_v1 = vsel %vm747_vm6, %v1432_v50, %v1434_v22  ;;  %1447 = vst.msk [vmem:[#allocation2 + $0xa8] sm:$0xf0] %vm3277_vm12, %v1434_v22  ;;  %vm1252_vm12 = vcmask 1043592  }
 0x367   : > { %1345 = vst.msk [vmem:[#allocation2 + $0x40] sm:$0xf0] %vm3278_vm0, %v1331_v23  ;;  %1445 = vst [vmem:[#allocation2 + $0xa0] sm:$0xf0] %v1439_v1  ;;  %vm1284_vm0 = vcmask 1047684  }
 0x369   : > { %v1374_v6 = vpop.permute.xlu1 %1373  ;;  %v1436_v7 = vpop.permute.xlu0 %1435 }
 0x36a   : > { %v1379_v11 = vsel %vm839_vm4, %v1372_v58, %v1374_v6  ;;  %1387 = vst.msk [vmem:[#allocation2 + $0x78] sm:$0xf0] %vm1386_vm15, %v1374_v6 }
 0x36b   : > { %1385 = vst [vmem:[#allocation2 + $0x70] sm:$0xf0] %v1379_v11 }
 0x36d   : > { %v1333_v60 = vpop.permute.xlu1 %1332  ;;  %v1376_v5 = vpop.permute.xlu0 %1375  ;;  %v1498_v16 = vld [vmem:[#allocation2 + $0xa8] sm:$0xff] }
 0x36e   : > { %v1485_v26 = vld [vmem:[#allocation2 + $0x40] sm:$0xff]  ;;  %v1338_v27 = vsel %vm3279_vm3, %v1331_v23, %v1333_v60 }
 0x36f   : > { %1592 = vst [vmem:[#allocation2 + $0x40] sm:$0xf] %v2349_v43  ;;  %1346 = vst [vmem:[#allocation2 + $0x48] sm:$0xf0] %v1338_v27  ;;  %v1497_v46 = vld [vmem:[#allocation2 + $0xa0] sm:$0xff] }
 0x371   : > { %v1438_v36 = vpop.permute.xlu1 %1437  ;;  %v1241_v39 = vpop.permute.xlu0 %1240  ;;  %v1492_v28 = vld [vmem:[#allocation2 + $0x78] sm:$0xff] }
 0x372   : > { %v1440_v29 = vsel %vm747_vm6, %v1436_v7, %v1438_v36  ;;  %1449 = vst.msk [vmem:[#allocation2 + $0xb8] sm:$0xff] %vm747_vm6, %v1438_v36  ;;  %v1512_v1 = vpack.c.bf16 %v1492_v28, %v2988_v63  ;;  %v1491_v6 = vld [vmem:[#allocation2 + $0x70] sm:$0xff]  ;;  %v1305_v63 = vsel %vm813_vm2, %v3076_v31, %v3090_v49  ;;  %v1793_v31 = vpack.c.bf16 %v2843_v56, %v2976_v9  ;;  %v1791_v56 = vld [vmem:[%s3261_s11] sm:$0x3] }
 0x373   : > { %1253 = vst.msk [vmem:[#allocation2 + $0x10] sm:$0xf] %vm1252_vm12, %v1241_v39  ;;  %v1515_v47 = vpack.c.bf16 %v1440_v29, %v1497_v46  ;;  %v1511_v60 = vpack.c.bf16 %v1491_v6, %v2998_v34  ;;  %v1792_v49 = vpack.c.bf16 %v2848_v59, %v2970_v3 }
 0x375   : > { %v1378_v30 = vpop.permute.xlu1 %1377  ;;  %v1335_v32 = vpop.permute.xlu0 %1334 }
 0x376   : > { %v1380_v12 = vsel %vm839_vm4, %v1376_v5, %v1378_v30  ;;  %1389 = vst.msk [vmem:[#allocation2 + $0x88] sm:$0xff] %vm839_vm4, %v1378_v30  ;;  %v1486_v38 = vld [vmem:[#allocation2 + $0x48] sm:$0xff] }
 0x377   : > { %1347 = vst.msk [vmem:[#allocation2 + $0x50] sm:$0xff] %vm866_vm9, %v1335_v32  ;;  %1593 = vst [vmem:[#allocation2 + $0x48] sm:$0xf] %v2349_v43  ;;  %v1513_v23 = vpack.c.bf16 %v3085_v40, %v1380_v12  ;;  %v1244_v12 = vsel %vm721_vm8, %v3082_v24, %v3097_v54  ;;  %vm1526_vm9 = vcmask 883712  }
 0x379   : > { %v1243_v42 = vpop.permute.xlu1 %1242  ;;  %v1275_v14 = vpop.permute.xlu0 %1274  ;;  %v1500_v25 = vld [vmem:[#allocation2 + $0xb8] sm:$0xff] }
 0x37a   : > { %v1245_v33 = vsel %vm721_vm8, %v1241_v39, %v1243_v42  ;;  %1287 = vst.msk [vmem:[#allocation2 + $0x20] sm:$0xff] %vm774_vm11, %v1275_v14  ;;  %v1516_v35 = vpack.c.bf16 %v1500_v25, %v1498_v16  ;;  %vm1800_vm11 = vcmask 97280  }
 0x37b   : > { %1254 = vst [vmem:[#allocation2 + $0x18] sm:$0xf] %v1245_v33 }
 0x37c   : > { %1541 = vmatprep.subr.bf16.mxu0 %v1516_v35 }
 0x37d   : > { %v1337_v50 = vpop.permute.xlu1 %1336  ;;  %1542 = vmatpush1.bf16.msra.mxu0 %v1515_v47  ;;  %v1271_v53 = vpop.permute.xlu0 %1270  ;;  %v1494_v51 = vld [vmem:[#allocation2 + $0x88] sm:$0xff] }
 0x37e   : > { %v1339_v58 = vsel %vm3279_vm3, %v1335_v32, %v1337_v50  ;;  %1285 = vst.msk [vmem:[#allocation2 + $0x10] sm:$0xf0] %vm1284_vm0, %v1271_v53  ;;  %v1514_v22 = vpack.c.bf16 %v1496_v21, %v1494_v51  ;;  %v1487_v27 = vld [vmem:[#allocation2 + $0x50] sm:$0xff] }
 0x37f   : > { %v1510_v5 = vpack.c.bf16 %v1339_v58, %v1486_v38  ;;  %v1509_v30 = vpack.c.bf16 %v1487_v27, %v1485_v26 }
 0x380   : > { %1543 = vmatprep.subr.bf16.mxu0 %v1514_v22 }
 0x381   : > { %v1277_v7 = vpop.permute.xlu1 %1276  ;;  %1544 = vmatpush1.bf16.msra.mxu0 %v1513_v23  ;;  %v1481_v11 = vld [vmem:[#allocation2 + $0x20] sm:$0xff] }
 0x382   : > { %1545 = vmatprep.subr.bf16.mxu0 %v1512_v1  ;;  %1588 = vst [vmem:[#allocation2 + $0x20] sm:$0xff] %v2349_v43  ;;  %v1279_v36 = vsel %vm767_vm1, %v1275_v14, %v1277_v7  ;;  %v1507_v34 = vpack.c.bf16 %v3092_v19, %v1481_v11  ;;  %v1519_v19 = vld [vmem:[%s3257_s7] sm:$0x3] }
 0x383   : > { %v1508_v32 = vpack.c.bf16 %v1305_v63, %v1279_v36 }
 0x385   : > { %v1273_v39 = vpop.permute.xlu1 %1272  ;;  %1546 = vmatpush1.bf16.msra.mxu0 %v1511_v60  ;;  %v1479_v29 = vld [vmem:[#allocation2 + $0x10] sm:$0xff] }
 0x386   : > { %v1278_v40 = vsel %vm767_vm1, %v1271_v53, %v1273_v39  ;;  %1547 = vmatprep.subr.bf16.mxu0 %v1510_v5  ;;  %1586 = vst [vmem:[#allocation2 + $0x10] sm:$0xff] %v2349_v43  ;;  %v1505_v14 = vpack.c.bf16 %v1479_v29, %v3099_v61 }
 0x387   : > { %1286 = vst [vmem:[#allocation2 + $0x18] sm:$0xf0] %v1278_v40 }
 0x389   : > { %1548 = vmatpush1.bf16.msra.mxu0 %v1509_v30 }
 0x38a   : > { %1549 = vmatprep.subr.bf16.mxu0 %v1508_v32  ;;  %v1524_v59 = vpop.permute.xlu0 %1523 }
 0x38d   : > { %1550 = vmatpush1.bf16.msra.mxu0 %v1507_v34 }
 0x38e   : > { %v1480_v38 = vld [vmem:[#allocation2 + $0x18] sm:$0xff] }
 0x38f   : > { %v1506_v42 = vpack.c.bf16 %v1480_v38, %v1244_v12  ;;  %1587 = vst [vmem:[#allocation2 + $0x18] sm:$0xff] %v2349_v43  ;;  %v1805_v43 = vsel %vm1530_vm10, %v1792_v49, 0 }
 0x391   : > { %1551 = vmatprep.subr.bf16.mxu0 %v1506_v42 }
 0x392   : > { %1552 = vmatpush1.bf16.msra.mxu0 %v1505_v14 }
 0x393   : > { %2034 = vmatprep.subr.msk.bf16.mxu0 %vm1530_vm10, %v1793_v31 }
 0x395   : > { %2031 = vmatmul.mubr.msk.bf16.vlgmr.msra.gmra.mxu0 %vm1526_vm9, %v1519_v19 }
 0x396   : > { %1825 = vmatpush1.bf16.msra.mxu0 %v1805_v43  ;;  %1842 = vmatprep.mubr.bf16.mxu0 %v2340_v0 }
 0x39d   : > { %2035 = vmatmul.mubr.msk.bf16.vlgmr.msra.gmra.mxu0 %vm1800_vm11, %v1791_v56 }
 0x455   : > { %v1571_v3 = vpop.f32.mrf.mxu0 }
 0x456   : > { %v1572_v9 = vadd.f32 %v1571_v3, %v1524_v59 }
 0x457   : > { %v1573_v24 = vpop.f32.mrf.mxu0 }
 0x458   : > { %vm1578_vm3 = vcmp.ge.f32.partialorder %v1572_v9, 0.0  ;;  %v1580_v54 = vmul.f32 0.2, %v1572_v9  ;;  %v1574_v61 = vadd.f32 %v1573_v24, %v1524_v59 }
 0x459   : > { %v1575_v26 = vpop.f32.mrf.mxu0 }
 0x45a   : > { %v1582_v16 = vsel %vm1578_vm3, %v1572_v9, %v1580_v54  ;;  %vm1579_vm9 = vcmp.ge.f32.partialorder %v1574_v61, 0.0  ;;  %v1581_v25 = vmul.f32 0.2, %v1574_v61  ;;  %vm1737_vm3 = vcmask 1041408  }
 0x45b   : > { %v1576_v33 = vpop.f32.mrf.mxu0  ;;  %v1697_v0 = vmul.f32 %v1582_v16, %v2808_v37  ;;  %v1669_v47 = vmul.f32 %v1582_v16, %v2673_v45  ;;  %v1650_v51 = vmul.f32 %v1582_v16, %v2619_v15  ;;  %v1594_v37 = vmul.f32 %v1582_v16, %v2759_v20 }
 0x45c   : > { %v1583_v35 = vsel %vm1579_vm9, %v1574_v61, %v1581_v25  ;;  %v1654_v45 = vmul.f32 %v1582_v16, %v2675_v48  ;;  %v1682_v21 = vmul.f32 %v1582_v16, %v2671_v44  ;;  %v1607_v48 = vmul.f32 %v1582_v16, %v2747_v13 }
 0x45d   : > { %1701 = vrot.lane.b32.xlu1 %v1697_v0, %s2347_s9  ;;  %v1698_v46 = vmul.f32 %v1583_v35, %v2818_v41  ;;  %v1651_v50 = vmul.f32 %v1583_v35, %v2621_v17  ;;  %v1670_v53 = vmul.f32 %v1583_v35, %v2694_v57  ;;  %1652 = vst [vmem:[#allocation2 + $0x20] sm:$0xf] %v1650_v51  ;;  %v3180_v23 = vpop.f32.mrf.mxu0 }
 0x45e   : > { %v1595_v41 = vmul.f32 %v1583_v35, %v2752_v18  ;;  %v1622_v17 = vmul.f32 %v1582_v16, %v2735_v8  ;;  %v1623_v15 = vmul.f32 %v1583_v35, %v2716_v2  ;;  %v1655_v57 = vmul.f32 %v1583_v35, %v2710_v62 }
 0x45f   : > { %1703 = vrot.lane.b32.xlu0 %v1698_v46, %s2347_s9  ;;  %1653 = vst [vmem:[#allocation2 + $0x28] sm:$0xf] %v1651_v50  ;;  %v1658_v20 = vrot.slane %v1654_v45, 4  ;;  %v1683_v28 = vmul.f32 %v1583_v35, %v2683_v52  ;;  %v1686_v8 = vrot.slane %v1682_v21, 4  ;;  %v1608_v62 = vmul.f32 %v1583_v35, %v2737_v10  ;;  %v3184_v6 = vpop.f32.mrf.mxu0  ;;  %s3309_s9 = sld [smem:[#allocation26_spill]] }
 0x460   : > { %v1659_v18 = vrot.slane %v1655_v57, 4  ;;  %v1611_v58 = vrot.slane %v1607_v48, 4  ;;  %v1635_v44 = vmul.f32 %v1582_v16, %v2723_v4  ;;  %v1636_v52 = vmul.f32 %v1583_v35, %v2687_v55  ;;  %v1794_v4 = vld [vmem:[%s3262_s12] sm:$0xf] }
 0x461   : > { %1673 = vrot.lane.b32.xlu1 %v1669_v47, %s2345_s20  ;;  %v1687_v2 = vrot.slane %v1683_v28, 4  ;;  %v1612_v22 = vrot.slane %v1608_v62, 4  ;;  %v1848_v10 = vpop.f32.mrf.mxu0  ;;  %v1727_v55 = vld [vmem:[%s3260_s10] sm:$0xf] }
 0x462   : > { %v1639_v13 = vrot.slane %v1635_v44, 4  ;;  %v1640_v1 = vrot.slane %v1636_v52, 4 }
 0x463   : > { %1675 = vrot.lane.b32.xlu0 %v1670_v53, %s2345_s20  ;;  %v1849_v7 = vpop.f32.mrf.mxu0  ;;  %s2350_s20 = smov [#allocation12]  }
 0x465   : > { %1598 = vrot.lane.b32.xlu1 %v1594_v37, %s2348_s17  ;;  %v1726_v45 = vld [vmem:[%s3309_s9] sm:$0x3] }
 0x467   : > { %1600 = vrot.lane.b32.xlu0 %v1595_v41, %s2348_s17  ;;  %s2013_s17 = sshll.u32 %s2581_s23, 3 }
 0x468   : > { %s538_s14 = scalar_lea.vmem [#allocation12], %s2013_s17 }
 0x469   : > { %1626 = vrot.lane.b32.xlu1 %v1622_v17, %s2342_s22  ;;  %s1873_s3 = sshll.u32 %s538_s14, 4  ;;  %s1874_s3 = int_to_ptr.vmem [resolvable:$true] %s1873_s3 }
 0x46b   : > { %1628 = vrot.lane.b32.xlu0 %v1623_v15, %s2342_s22  ;;  %s1859_s22 = scalar_lea.sflag [#allocation6], %s2581_s23 }
 0x46d   : > { %1660 = vrot.lane.b32.xlu1 %v1658_v20, %s2344_s24 }
 0x46f   : > { %1662 = vrot.lane.b32.xlu0 %v1659_v18, %s2344_s24  ;;  %s2254_s24 = scalar_lea.vmem %s1874_s3, 128 }
 0x470   : > { %p2255_p3 = scmp.ne.s32.totalorder %s1874_s3, %s2254_s24 }
 0x471   : > { %1688 = vrot.lane.b32.xlu1 %v1686_v8, %s2346_s18 }
 0x472   : > { %p2256_p13 = pnand %p2255_p3, %p3313_p9 }
 0x473   : > { %1690 = vrot.lane.b32.xlu0 %v1687_v2, %s2346_s18  ;;  %s2258_s18 = sshll.u32 %s2350_s20, 4  ;;  %s2259_s18 = int_to_ptr.vmem [resolvable:$false] %s2258_s18 }
 0x474   : > { %p2257_p5 = pneg %p2256_p13  ;;  %s2260_s29 = scalar_lea.vmem %s2259_s18, 256 }
 0x475   : > { %1613 = vrot.lane.b32.xlu1 %v1611_v58, %s2341_s19  ;;  %p2261_p1 = scmp.lt.s32.totalorder %s1874_s3, %s2259_s18  ;;  %p2262_p7 = scmp.lt.s32.totalorder %s2260_s29, %s2254_s24 }
 0x477   : > { %1615 = vrot.lane.b32.xlu0 %v1612_v22, %s2341_s19  ;;  %p2263_p4 = por %p2262_p7, %p2261_p1 }
 0x479   : > { %1641 = vrot.lane.b32.xlu1 %v1639_v13, %s2343_s21  ;;  %p2264_p10 = pnand %p2263_p4, %p2257_p5 }
 0x47b   : > { %1643 = vrot.lane.b32.xlu0 %v1640_v1, %s2343_s21 }
 0x47d   : > { %1730 = vperm.xlu1 %2132, %v1727_v55  }
 0x47f   : > { %1797 = vperm.xlu0 %2131, %v1794_v4  }
 0x4cf   : > { %v1702_v11 = vpop.permute.xlu1 %1701 }
 0x4d1   : > { %v1704_v60 = vpop.permute.xlu0 %1703 }
 0x4d2   : > { %v1705_v5 = vsel %vm701_vm7, %v1702_v11, %v1704_v60  ;;  %1709 = vst.msk [vmem:[#allocation2 + $0x48] sm:$0xf] %vm1475_vm13, %v1704_v60  ;;  %vm3305_vm7 = vcmask 1043576  }
 0x4d3   : > { %1708 = vst [vmem:[#allocation2 + $0x40] sm:$0xf] %v1705_v5  ;;  %v1674_v27 = vpop.permute.xlu1 %1673 }
 0x4d5   : > { %v1676_v36 = vpop.permute.xlu0 %1675 }
 0x4d6   : > { %v1677_v39 = vsel %vm793_vm5, %v1674_v27, %v1676_v36  ;;  %1681 = vst.msk [vmem:[#allocation2 + $0x38] sm:$0xf] %vm1415_vm14, %v1676_v36  ;;  %vm3306_vm5 = vcmask 916484  }
 0x4d7   : > { %1680 = vst [vmem:[#allocation2 + $0x30] sm:$0xf] %v1677_v39  ;;  %v1599_v29 = vpop.permute.xlu1 %1598 }
 0x4d8   : > { %1605 = vst.msk [vmem:[#allocation2] sm:$0xf] %vm1252_vm12, %v1599_v29 }
 0x4d9   : > { %v1601_v40 = vpop.permute.xlu0 %1600  ;;  %v1719_v63 = vld [vmem:[#allocation2 + $0x48] sm:$0xf] }
 0x4da   : > { %v1602_v30 = vsel %vm721_vm8, %v1599_v29, %v1601_v40  ;;  %v1725_v32 = vpack.c.bf16 %v1719_v63, %v1719_v63  ;;  %v1718_v34 = vld [vmem:[#allocation2 + $0x40] sm:$0xf] }
 0x4db   : > { %1606 = vst [vmem:[#allocation2 + $0x8] sm:$0xf] %v1602_v30  ;;  %v1627_v12 = vpop.permute.xlu1 %1626  ;;  %v1724_v38 = vpack.c.bf16 %v1718_v34, %v1718_v34 }
 0x4dc   : > { %1633 = vst.msk [vmem:[#allocation2 + $0x10] sm:$0xf] %vm3305_vm7, %v1627_v12  ;;  %2032 = vmatprep.subr.msk.bf16.mxu1 %vm1737_vm3, %v1725_v32 }
 0x4dd   : > { %v1629_v42 = vpop.permute.xlu0 %1628  ;;  %v1739_v14 = vsel %vm1737_vm3, %v1724_v38, 0 }
 0x4de   : > { %v1630_v31 = vsel %vm813_vm2, %v1627_v12, %v1629_v42  ;;  %1755 = vmatpush1.bf16.msra.mxu1 %v1739_v14  ;;  %vm3307_vm2 = vcmask 1047564  }
 0x4df   : > { %1634 = vst [vmem:[#allocation2 + $0x18] sm:$0xf] %v1630_v31  ;;  %v1661_v49 = vpop.permute.xlu1 %1660 }
 0x4e1   : > { %v1663_v19 = vpop.permute.xlu0 %1662 }
 0x4e2   : > { %v1664_v43 = vsel %vm839_vm4, %v1661_v49, %v1663_v19  ;;  %1668 = vst.msk [vmem:[#allocation2 + $0x28] sm:$0xf0] %vm1386_vm15, %v1663_v19  ;;  %vm3308_vm4 = vcmask 7168  }
 0x4e3   : > { %1667 = vst [vmem:[#allocation2 + $0x20] sm:$0xf0] %v1664_v43  ;;  %v1689_v56 = vpop.permute.xlu1 %1688 }
 0x4e5   : > { %v1691_v59 = vpop.permute.xlu0 %1690 }
 0x4e6   : > { %v1692_v3 = vsel %vm747_vm6, %v1689_v56, %v1691_v59  ;;  %1696 = vst.msk [vmem:[#allocation2 + $0x38] sm:$0xf0] %vm3306_vm5, %v1691_v59 }
 0x4e7   : > { %1695 = vst [vmem:[#allocation2 + $0x30] sm:$0xf0] %v1692_v3  ;;  %v1614_v9 = vpop.permute.xlu1 %1613 }
 0x4e8   : > { %1620 = vst.msk [vmem:[#allocation2] sm:$0xf0] %vm1284_vm0, %v1614_v9 }
 0x4e9   : > { %v1616_v24 = vpop.permute.xlu0 %1615  ;;  %v1715_v16 = vld [vmem:[#allocation2 + $0x28] sm:$0xff] }
 0x4ea   : > { %v1617_v54 = vsel %vm767_vm1, %v1614_v9, %v1616_v24  ;;  %v1714_v35 = vld [vmem:[#allocation2 + $0x20] sm:$0xff]  ;;  %vm1733_vm1 = vcmask 293888  }
 0x4eb   : > { %1621 = vst [vmem:[#allocation2 + $0x8] sm:$0xf0] %v1617_v54  ;;  %v1642_v61 = vpop.permute.xlu1 %1641 }
 0x4ec   : > { %1648 = vst.msk [vmem:[#allocation2 + $0x10] sm:$0xf0] %vm3307_vm2, %v1642_v61 }
 0x4ed   : > { %v1644_v26 = vpop.permute.xlu0 %1643  ;;  %v1717_v25 = vld [vmem:[#allocation2 + $0x38] sm:$0xff] }
 0x4ee   : > { %v1645_v33 = vsel %vm3308_vm4, %v1642_v61, %v1644_v26  ;;  %v1723_v0 = vpack.c.bf16 %v1717_v25, %v1715_v16  ;;  %v1716_v46 = vld [vmem:[#allocation2 + $0x30] sm:$0xff] }
 0x4ef   : > { %1649 = vst [vmem:[#allocation2 + $0x18] sm:$0xf0] %v1645_v33  ;;  %v1722_v47 = vpack.c.bf16 %v1716_v46, %v1714_v35  ;;  %v1710_v41 = vld [vmem:[#allocation2] sm:$0xff] }
 0x4f0   : > { %1756 = vmatprep.subr.bf16.mxu1 %v1723_v0 }
 0x4f1   : > { %1757 = vmatpush1.bf16.msra.mxu1 %v1722_v47 }
 0x4f2   : > { %v1711_v53 = vld [vmem:[#allocation2 + $0x8] sm:$0xff] }
 0x4f3   : > { %v1712_v50 = vld [vmem:[#allocation2 + $0x10] sm:$0xff] }
 0x4f4   : > { %v1720_v17 = vpack.c.bf16 %v1712_v50, %v1710_v41 }
 0x4f6   : > { %v1713_v51 = vld [vmem:[#allocation2 + $0x18] sm:$0xff] }
 0x4f7   : > { %v1721_v37 = vpack.c.bf16 %v1713_v51, %v1711_v53 }
 0x4f8   : > { %v1731_v15 = vpop.permute.xlu1 %1730 }
 0x4f9   : > { %1758 = vmatprep.subr.bf16.mxu1 %v1721_v37 }
 0x4fa   : > { %1759 = vmatpush1.bf16.msra.mxu1 %v1720_v17  ;;  %v1798_v18 = vpop.permute.xlu0 %1797 }
 0x4fb   : > { %v1845_v58 = vadd.f32 %v3180_v23, %v1798_v18  ;;  %v1847_v44 = vadd.f32 %v3184_v6, %v1798_v18 }
 0x4fd   : > { %2033 = vmatmul.mubr.msk.bf16.vlgmr.msra.gmra.mxu1 %vm1733_vm1, %v1726_v45 }
 0x5bd   : > { %v1778_v57 = vpop.f32.mrf.mxu1 }
 0x5be   : > { %v1779_v20 = vadd.f32 %v1778_v57, %v1731_v15 }
 0x5bf   : > { %v1780_v21 = vpop.f32.mrf.mxu1 }
 0x5c0   : > { %vm1785_vm6 = vcmp.ge.f32.partialorder %v1779_v20, 0.0  ;;  %v1787_v28 = vmul.f32 0.2, %v1779_v20  ;;  %v1781_v8 = vadd.f32 %v1780_v21, %v1731_v15 }
 0x5c1   : > { %v1782_v48 = vpop.f32.mrf.mxu1 }
 0x5c2   : > { %v1789_v2 = vsel %vm1785_vm6, %v1779_v20, %v1787_v28  ;;  %vm1786_vm8 = vcmp.ge.f32.partialorder %v1781_v8, 0.0  ;;  %v1788_v62 = vmul.f32 0.2, %v1781_v8 }
 0x5c3   : > { %v1783_v22 = vpop.f32.mrf.mxu1  ;;  %v1851_v13 = vadd.f32 %v1845_v58, %v1789_v2 }
 0x5c4   : > { %v1790_v52 = vsel %vm1786_vm8, %v1781_v8, %v1788_v62 }
 0x5c5   : > { %v1852_v1 = vadd.f32 %v1847_v44, %v1790_v52 }
 0x5c7   : > { %v1855_v10 = vcombine.low %v1851_v13, %v1852_v1 }
 0x5c9   : > { %1857 = vst [vmem:[%s538_s14] sm:$0xff] %v1855_v10 }
 0x5ca   : > { %2267 = shalt.err (!%p2264_p10)
}
 0x5cb   : > { %s2268_s19 = scalar_lea.hbm %s1871_s4, 128  ;;  %s2272_s9 = scalar_lea.hbm %s3312_s13, 256 }
 0x5cc   : > { %p2269_p0 = scmp.ne.s32.totalorder %s1871_s4, %s2268_s19  ;;  %p2273_p2 = scmp.lt.s32.totalorder %s1871_s4, %s3312_s13 }
 0x5cd   : > { %p2274_p6 = scmp.lt.s32.totalorder %s2272_s9, %s2268_s19 }
 0x5ce   : > { %p2270_p8 = pnand %p2269_p0, %p3313_p9 }
 0x5cf   : > { %p2275_p12 = por %p2274_p6, %p2273_p2 }
 0x5d0   : > { %p2271_p11 = pneg %p2270_p8 }
 0x5d2   : > { %p2276_p3 = pnand %p2275_p12, %p2271_p11 }
 0x5d4   : > { %2279 = shalt.err (!%p2276_p3)
}
 0x5d5   : > { %2057 = dma.vmem_to_hbm [thread:$0]  (%p3313_p9), %s1874_s3, 128, %s1871_s4, %s1859_s22  }
 0x5d6 PF: > { %s3314_s14 = sld [smem:[#allocation18_spill]]  ;;  %p3317_p5 = scmp.ge.s32.totalorder %s2330_s28, 2 }
 0x5d7   : > { %s3315_s25 = sld [smem:[#allocation20_spill]] }
 0x5dc   : > { %s1885_s15 = sand.u32 1, %s3314_s14  }
 0x5dd   : > { %p3316_p13 = scmp.ne.s32.totalorder %s3315_s25, 0  ;;  %s1886_s27 = scalar_lea.sflag [#allocation6], %s1885_s15 }
 0x5df   : > { %p2074_p1 = pnand %p3317_p5, %p3316_p13 }
 0x5e1   : > { %p2075_p7 = pneg %p2074_p1 }
 0x5e3   : > { %2313 = dma.done.wait (%p2075_p7), %s1886_s27, 128  }
 0x5e4   : > { %2315 = vsyncadd (%p2075_p7), %s1886_s27, 4294967168  ;;  %s3318_s28 = sld [smem:[#allocation21_spill]]  ;;  %s3321_s25 = smov %s2322_s26 }
 0x5e5   : > { %s3319_s24 = sld [smem:[#allocation19_spill]] }
 0x5e6   : > { %s3320_s27 = sld [smem:[#allocation22_spill]] }
 0x5ea   : > { %p30_p4 = scmp.ge.s32.totalorder %s3318_s28, 4  }
 0x5eb   : > { %s3322_s26 = smov %s3319_s24 }
 0x5ec   :  { %32 = sbr.rel (!%p30_p4) target bundleno = 13 (0xd), region = 141 }
 0x5f1   :  { %1891 = vsyncpa [#allocation5], 1 }
 0x5f2   :  { %1893 = vsyncpa [#allocation5 + $0x1], 1 }
 0x5f3   :  { %1894 = vsyncpa [#allocation8], 1 }
 0x5f4   :  { %1896 = vsyncpa [#allocation8 + $0x1], 1 }
 0x5f5   :  { %1897 = vsyncpa [#allocation11], 1 }
 0x5f6   :  { %1898 = vsyncpa [#allocation6], 1 }
 0x5f7   :  { %1900 = vsyncpa [#allocation6 + $0x1], 1 }

</bundles_post_ra>
